<compile_context>
chip_gen: v5e
topology: v5e:2x2
jax: 0.10.0
libtpu: 0.0.40
codegen_flags: <defaults>
</compile_context>

<pallas_src>
import functools
import jax
import jax.numpy as jnp
from jax import lax
from jax.experimental import pallas as pl
from jax.experimental.pallas import tpu as pltpu

EPS = 1e-5                       # nn.LayerNorm default
VMEM_LIMIT = 32 * 1024 * 1024    # safe on v5e/v6e (128 MiB) and v7x (64 MiB)


# ------------------------------------------------------------ in-kernel math

def _layer_norm(x, g, b):
    mean = jnp.mean(x, axis=-1, keepdims=True)
    var = jnp.mean(jnp.square(x - mean), axis=-1, keepdims=True)
    return (x - mean) * lax.rsqrt(var + EPS) * g + b


def _mha_core(q, k, v, wo, bo, nhead, want_probs):
    """Per-head SDPA + output projection, fully in VMEM.

    q: (T, E) already scaled; k, v: (S, E); wo: (E, E); bo: (1, E).
    Heads are static lane slices.  The output projection is accumulated per head
    so no in-kernel concatenate is needed.
    """
    T, E = q.shape
    S = k.shape[0]
    Dh = E // nhead
    dn = (((1,), (1,)), ((), ()))          # contract last dims, no batch dims
    acc = jnp.zeros((T, E), jnp.float32)
    p_sum = jnp.zeros((T, S), jnp.float32) if want_probs else None
    for h in range(nhead):
        sl = slice(h * Dh, (h + 1) * Dh)
        s = lax.dot_general(q[:, sl], k[:, sl], dn,
                            preferred_element_type=jnp.float32)        # (T, S)
        m = jnp.max(s, axis=-1, keepdims=True)
        e = jnp.exp(s - m)
        p = e * pl.reciprocal(jnp.sum(e, axis=-1, keepdims=True), approx=True)
        if want_probs:
            p_sum = p_sum + p
        oh = jnp.dot(p, v[:, sl], preferred_element_type=jnp.float32)  # (T, Dh)
        acc = acc + jnp.dot(oh, wo[sl, :], preferred_element_type=jnp.float32)
    return acc + bo, p_sum


# ----------------------------------------------------------------- kernels

def _self_attn_kernel(x_ref, g_ref, b_ref, wq_ref, bq_ref, wk_ref, bk_ref,
                      wv_ref, bv_ref, wo_ref, bo_ref, o_ref, *, nhead, scale):
    x = x_ref[...].astype(jnp.float32)                         # (T, E) residual
    xn = _layer_norm(x, g_ref[...], b_ref[...])
    q = (jnp.dot(xn, wq_ref[...], preferred_element_type=jnp.float32)
         + bq_ref[...]) * scale
    k = jnp.dot(xn, wk_ref[...], preferred_element_type=jnp.float32) + bk_ref[...]
    v = jnp.dot(xn, wv_ref[...], preferred_element_type=jnp.float32) + bv_ref[...]
    y, _ = _mha_core(q, k, v, wo_ref[...], bo_ref[...], nhead, want_probs=False)
    o_ref[...] = (x + y).astype(o_ref.dtype)


def _cross_attn_kernel(x_ref, enc_ref, g_ref, b_ref, wq_ref, bq_ref, wk_ref,
                       bk_ref, wv_ref, bv_ref, wo_ref, bo_ref,
                       o_ref, attn_ref, *, nhead, scale):
    x = x_ref[...].astype(jnp.float32)                         # (T, E) residual
    enc = enc_ref[...].astype(jnp.float32)                     # (S, Ee)
    xn = _layer_norm(x, g_ref[...], b_ref[...])
    q = (jnp.dot(xn, wq_ref[...], preferred_element_type=jnp.float32)
         + bq_ref[...]) * scale
    k = jnp.dot(enc, wk_ref[...], preferred_element_type=jnp.float32) + bk_ref[...]
    v = jnp.dot(enc, wv_ref[...], preferred_element_type=jnp.float32) + bv_ref[...]
    y, p_sum = _mha_core(q, k, v, wo_ref[...], bo_ref[...], nhead, want_probs=True)
    o_ref[...] = (x + y).astype(o_ref.dtype)
    attn_ref[...] = (p_sum * (1.0 / nhead)).astype(attn_ref.dtype)


def _ffn_kernel(x_ref, g_ref, b_ref, w1_ref, b1_ref, w2_ref, b2_ref, o_ref):
    x = x_ref[...].astype(jnp.float32)                         # (rows, E) residual
    xn = _layer_norm(x, g_ref[...], b_ref[...])
    h = jnp.dot(xn, w1_ref[...], preferred_element_type=jnp.float32) + b1_ref[...]
    h = jnp.maximum(h, 0.0)
    y = jnp.dot(h, w2_ref[...], preferred_element_type=jnp.float32) + b2_ref[...]
    o_ref[...] = (x + y).astype(o_ref.dtype)


# ----------------------------------------------------------------- wrappers

def _rep2d(shape):
    # weight / bias block that is resident across the (rank-1) grid
    return pl.BlockSpec(shape, lambda i: (0, 0))


def self_attn_block(xb, p, nhead):
    B, T, E = xb.shape
    scale = (E // nhead) ** -0.5
    kern = functools.partial(_self_attn_kernel, nhead=nhead, scale=scale)
    row = lambda a: a.reshape(1, -1)
    return pl.pallas_call(
        kern,
        grid=(B,),
        out_shape=jax.ShapeDtypeStruct((B, T, E), xb.dtype),
        in_specs=[
            pl.BlockSpec((None, T, E), lambda i: (i, 0, 0)),
            _rep2d((1, E)), _rep2d((1, E)),          # LN gamma / beta
            _rep2d((E, E)), _rep2d((1, E)),          # Wq, bq
            _rep2d((E, E)), _rep2d((1, E)),          # Wk, bk
            _rep2d((E, E)), _rep2d((1, E)),          # Wv, bv
            _rep2d((E, E)), _rep2d((1, E)),          # Wo, bo
        ],
        out_specs=pl.BlockSpec((None, T, E), lambda i: (i, 0, 0)),
        compiler_params=pltpu.CompilerParams(
            dimension_semantics=("parallel",),
            vmem_limit_bytes=VMEM_LIMIT),
    )(xb, row(p["ln_sa_g"]), row(p["ln_sa_b"]),
      p["sa_q_w"], row(p["sa_q_b"]),
      p["sa_k_w"], row(p["sa_k_b"]),
      p["sa_v_w"], row(p["sa_v_b"]),
      p["sa_o_w"], row(p["sa_o_b"]))


def cross_attn_block(xb, encb, p, nhead):
    B, T, E = xb.shape
    S, Ee = encb.shape[1], encb.shape[2]
    scale = (E // nhead) ** -0.5
    kern = functools.partial(_cross_attn_kernel, nhead=nhead, scale=scale)
    row = lambda a: a.reshape(1, -1)
    return pl.pallas_call(
        kern,
        grid=(B,),
        out_shape=(jax.ShapeDtypeStruct((B, T, E), xb.dtype),
                   jax.ShapeDtypeStruct((B, T, S), jnp.float32)),
        in_specs=[
            pl.BlockSpec((None, T, E), lambda i: (i, 0, 0)),
            pl.BlockSpec((None, S, Ee), lambda i: (i, 0, 0)),
            _rep2d((1, E)), _rep2d((1, E)),          # LN gamma / beta
            _rep2d((E, E)), _rep2d((1, E)),          # Wq, bq
            _rep2d((Ee, E)), _rep2d((1, E)),         # Wk, bk
            _rep2d((Ee, E)), _rep2d((1, E)),         # Wv, bv
            _rep2d((E, E)), _rep2d((1, E)),          # Wo, bo
        ],
        out_specs=(pl.BlockSpec((None, T, E), lambda i: (i, 0, 0)),
                   pl.BlockSpec((None, T, S), lambda i: (i, 0, 0))),
        compiler_params=pltpu.CompilerParams(
            dimension_semantics=("parallel",),
            vmem_limit_bytes=VMEM_LIMIT),
    )(xb, encb, row(p["ln_ca_g"]), row(p["ln_ca_b"]),
      p["ca_q_w"], row(p["ca_q_b"]),
      p["ca_k_w"], row(p["ca_k_b"]),
      p["ca_v_w"], row(p["ca_v_b"]),
      p["ca_o_w"], row(p["ca_o_b"]))


def ffn_block(x2d, p):
    N, E = x2d.shape
    F = p["fc1_w"].shape[1]
    # Row-tile the token dim (parallel across cores); the (rows, F) hidden
    # activation never leaves VMEM.
    row_tile = N
    for cand in (512, 256, 128, 64, 32, 16, 8):
        if N % cand == 0:
            row_tile = cand
            break
    rowv = lambda a: a.reshape(1, -1)
    return pl.pallas_call(
        _ffn_kernel,
        grid=(N // row_tile,),
        out_shape=jax.ShapeDtypeStruct((N, E), x2d.dtype),
        in_specs=[
            pl.BlockSpec((row_tile, E), lambda i: (i, 0)),
            _rep2d((1, E)), _rep2d((1, E)),          # LN gamma / beta
            _rep2d((E, F)), _rep2d((1, F)),          # fc1
            _rep2d((F, E)), _rep2d((1, E)),          # fc2
        ],
        out_specs=pl.BlockSpec((row_tile, E), lambda i: (i, 0)),
        compiler_params=pltpu.CompilerParams(
            dimension_semantics=("parallel",),
            vmem_limit_bytes=VMEM_LIMIT),
    )(x2d, rowv(p["ln_f_g"]), rowv(p["ln_f_b"]),
      p["fc1_w"], rowv(p["fc1_b"]), p["fc2_w"], rowv(p["fc2_b"]))


def transformer_decoder_layer(x, encoder_out, params, nhead):
    """Returns (x, attn, None) like the torch module (pre-LN, eval mode)."""
    T, B, E = x.shape
    # Batch-major layout: each grid step owns one batch element's full sequence;
    # head split/merge happens in-kernel, so no per-projection relayouts.
    xb = jnp.transpose(x, (1, 0, 2))                  # (B, T, E)
    encb = jnp.transpose(encoder_out, (1, 0, 2))      # (B, S, Ee)

    xb = self_attn_block(xb, params, nhead)
    xb, attn = cross_attn_block(xb, encb, params, nhead)
    x2 = ffn_block(xb.reshape(B * T, E), params)      # free reshape (row-major)

    out = jnp.transpose(x2.reshape(B, T, E), (1, 0, 2))   # back to (T, B, E)
    return out, attn, None


# ------------------------------------------------------------ pure-JAX ref

def _ref_ln(x, g, b):
    m = jnp.mean(x, axis=-1, keepdims=True)
    v = jnp.mean(jnp.square(x - m), axis=-1, keepdims=True)
    return (x - m) * lax.rsqrt(v + EPS) * g + b


def _ref_mha(query, key, value, p, nhead, prefix):
    T, B, E = query.shape
    S = key.shape[0]
    Dh = E // nhead
    scale = Dh ** -0.5
    q = query @ p[prefix + "q_w"] + p[prefix + "q_b"]
    k = key @ p[prefix + "k_w"] + p[prefix + "k_b"]
    v = value @ p[prefix + "v_w"] + p[prefix + "v_b"]
    qh = q.reshape(T, B, nhead, Dh).transpose(1, 2, 0, 3)
    kh = k.reshape(S, B, nhead, Dh).transpose(1, 2, 0, 3)
    vh = v.reshape(S, B, nhead, Dh).transpose(1, 2, 0, 3)
    s = jnp.einsum("bhtd,bhsd->bhts", qh * scale, kh)
    pr = jax.nn.softmax(s, axis=-1)
    oh = jnp.einsum("bhts,bhsd->bhtd", pr, vh)
    o = oh.transpose(2, 0, 1, 3).reshape(T, B, E)
    o = o @ p[prefix + "o_w"] + p[prefix + "o_b"]
    return o, pr.mean(axis=1)


def ref_layer(x, encoder_out, p, nhead):
    res = x
    xn = _ref_ln(x, p["ln_sa_g"], p["ln_sa_b"])
    sa, _ = _ref_mha(xn, xn, xn, p, nhead, "sa_")
    x = res + sa
    res = x
    xn = _ref_ln(x, p["ln_ca_g"], p["ln_ca_b"])
    ca, attn = _ref_mha(xn, encoder_out, encoder_out, p, nhead, "ca_")
    x = res + ca
    res = x
    xn = _ref_ln(x, p["ln_f_g"], p["ln_f_b"])
    h = jnp.maximum(xn @ p["fc1_w"] + p["fc1_b"], 0.0)
    h = h @ p["fc2_w"] + p["fc2_b"]
    return res + h, attn


# ---------------------------------------------------------------- main ------

if __name__ == "__main__":
    # small shapes consistent with the module's forward
    T, B, S = 8, 2, 12
    E, FFN, H, Ee = 32, 64, 4, 48   # embed, ffn_embed, nhead, encoder_embed_dim
    dtype = jnp.float32

    key = jax.random.PRNGKey(0)
    keys = iter(jax.random.split(key, 64))

    def w(shape, scale=0.05):
        return (scale * jax.random.normal(next(keys), shape)).astype(dtype)

    params = {
        "ln_sa_g": (1.0 + 0.1 * jax.random.normal(next(keys), (E,))).astype(dtype),
        "ln_sa_b": w((E,), 0.1),
        "sa_q_w": w((E, E)), "sa_q_b": w((E,), 0.02),
        "sa_k_w": w((E, E)), "sa_k_b": w((E,), 0.02),
        "sa_v_w": w((E, E)), "sa_v_b": w((E,), 0.02),
        "sa_o_w": w((E, E)), "sa_o_b": w((E,), 0.02),
        "ln_ca_g": (1.0 + 0.1 * jax.random.normal(next(keys), (E,))).astype(dtype),
        "ln_ca_b": w((E,), 0.1),
        "ca_q_w": w((E, E)),  "ca_q_b": w((E,), 0.02),
        "ca_k_w": w((Ee, E)), "ca_k_b": w((E,), 0.02),
        "ca_v_w": w((Ee, E)), "ca_v_b": w((E,), 0.02),
        "ca_o_w": w((E, E)),  "ca_o_b": w((E,), 0.02),
        "ln_f_g": (1.0 + 0.1 * jax.random.normal(next(keys), (E,))).astype(dtype),
        "ln_f_b": w((E,), 0.1),
        "fc1_w": w((E, FFN)), "fc1_b": w((FFN,), 0.02),
        "fc2_w": w((FFN, E)), "fc2_b": w((E,), 0.02),
    }

    x = jax.random.normal(next(keys), (T, B, E), dtype=dtype)
    encoder_out = jax.random.normal(next(keys), (S, B, Ee), dtype=dtype)

    out, attn, _ = jax.jit(transformer_decoder_layer, static_argnums=(3,))(
        x, encoder_out, params, H
    )
    out = jax.block_until_ready(out)
    attn = jax.block_until_ready(attn)

    ref_out, ref_attn = ref_layer(x, encoder_out, params, H)

    assert out.shape == (T, B, E) and attn.shape == (B, T, S)
    # tolerance loosened slightly for approx-reciprocal softmax normalization
    assert jnp.allclose(out, ref_out, atol=2e-3, rtol=2e-3), "output mismatch"
    assert jnp.allclose(attn, ref_attn, atol=2e-3, rtol=2e-3), "attn mismatch"

    print("KERNEL_OK")
</pallas_src>

<mosaic_0001>
module attributes {stable_mosaic.version = 11 : i64} {
  func.func @_self_attn_kernel(%arg0: i32, %arg1: memref<1x8x32xf32, #tpu.memory_space<vmem>>, %arg2: memref<1x32xf32, #tpu.memory_space<vmem>>, %arg3: memref<1x32xf32, #tpu.memory_space<vmem>>, %arg4: memref<32x32xf32, #tpu.memory_space<vmem>>, %arg5: memref<1x32xf32, #tpu.memory_space<vmem>>, %arg6: memref<32x32xf32, #tpu.memory_space<vmem>>, %arg7: memref<1x32xf32, #tpu.memory_space<vmem>>, %arg8: memref<32x32xf32, #tpu.memory_space<vmem>>, %arg9: memref<1x32xf32, #tpu.memory_space<vmem>>, %arg10: memref<32x32xf32, #tpu.memory_space<vmem>>, %arg11: memref<1x32xf32, #tpu.memory_space<vmem>>, %arg12: memref<1x8x32xf32, #tpu.memory_space<vmem>>) attributes {dimension_semantics = [#tpu.dimension_semantics<parallel>], iteration_bounds = array<i64: 2>, scalar_prefetch = 0 : i64, scratch_operands = 0 : i64, tpu.core_type = #tpu.core_type<tc>, window_params = [{transform_indices = @transform_0, window_bounds = array<i64: 1, 8, 32>}, {pipeline_mode = #tpu.pipeline_mode<synchronous>, transform_indices = @transform_1, window_bounds = array<i64: 1, 32>}, {pipeline_mode = #tpu.pipeline_mode<synchronous>, transform_indices = @transform_2, window_bounds = array<i64: 1, 32>}, {pipeline_mode = #tpu.pipeline_mode<synchronous>, transform_indices = @transform_3, window_bounds = array<i64: 32, 32>}, {pipeline_mode = #tpu.pipeline_mode<synchronous>, transform_indices = @transform_4, window_bounds = array<i64: 1, 32>}, {pipeline_mode = #tpu.pipeline_mode<synchronous>, transform_indices = @transform_5, window_bounds = array<i64: 32, 32>}, {pipeline_mode = #tpu.pipeline_mode<synchronous>, transform_indices = @transform_6, window_bounds = array<i64: 1, 32>}, {pipeline_mode = #tpu.pipeline_mode<synchronous>, transform_indices = @transform_7, window_bounds = array<i64: 32, 32>}, {pipeline_mode = #tpu.pipeline_mode<synchronous>, transform_indices = @transform_8, window_bounds = array<i64: 1, 32>}, {pipeline_mode = #tpu.pipeline_mode<synchronous>, transform_indices = @transform_9, window_bounds = array<i64: 32, 32>}, {pipeline_mode = #tpu.pipeline_mode<synchronous>, transform_indices = @transform_10, window_bounds = array<i64: 1, 32>}, {transform_indices = @transform_11, window_bounds = array<i64: 1, 8, 32>}]} {
    %c0 = arith.constant 0 : index
    %c0_0 = arith.constant 0 : index
    %c0_1 = arith.constant 0 : index
    %0 = vector.load %arg1[%c0, %c0_0, %c0_1] : memref<1x8x32xf32, #tpu.memory_space<vmem>>, vector<1x8x32xf32>
    %1 = vector.shape_cast %0 : vector<1x8x32xf32> to vector<8x32xf32>
    %c0_2 = arith.constant 0 : index
    %c0_3 = arith.constant 0 : index
    %2 = vector.load %arg2[%c0_2, %c0_3] : memref<1x32xf32, #tpu.memory_space<vmem>>, vector<1x32xf32>
    %c0_4 = arith.constant 0 : index
    %c0_5 = arith.constant 0 : index
    %3 = vector.load %arg3[%c0_4, %c0_5] : memref<1x32xf32, #tpu.memory_space<vmem>>, vector<1x32xf32>
    %cst = arith.constant dense<0.000000e+00> : vector<8xf32>
    %4 = vector.multi_reduction <add>, %1, %cst [1] : vector<8x32xf32> to vector<8xf32>
    %5 = vector.shape_cast %4 : vector<8xf32> to vector<8x1xf32>
    %cst_6 = arith.constant 3.200000e+01 : f32
    %6 = vector.broadcast %cst_6 : f32 to vector<8x1xf32>
    %7 = arith.divf %5, %6 : vector<8x1xf32>
    %8 = vector.broadcast %7 : vector<8x1xf32> to vector<8x32xf32>
    %9 = arith.subf %1, %8 : vector<8x32xf32>
    %10 = arith.mulf %9, %9 : vector<8x32xf32>
    %cst_7 = arith.constant dense<0.000000e+00> : vector<8xf32>
    %11 = vector.multi_reduction <add>, %10, %cst_7 [1] : vector<8x32xf32> to vector<8xf32>
    %12 = vector.shape_cast %11 : vector<8xf32> to vector<8x1xf32>
    %cst_8 = arith.constant 3.200000e+01 : f32
    %13 = vector.broadcast %cst_8 : f32 to vector<8x1xf32>
    %14 = arith.divf %12, %13 : vector<8x1xf32>
    %15 = vector.broadcast %7 : vector<8x1xf32> to vector<8x32xf32>
    %16 = arith.subf %1, %15 : vector<8x32xf32>
    %cst_9 = arith.constant 9.99999974E-6 : f32
    %17 = vector.broadcast %cst_9 : f32 to vector<8x1xf32>
    %18 = arith.addf %14, %17 : vector<8x1xf32>
    %19 = math.rsqrt %18 : vector<8x1xf32>
    %20 = vector.broadcast %19 : vector<8x1xf32> to vector<8x32xf32>
    %21 = arith.mulf %16, %20 : vector<8x32xf32>
    %22 = vector.broadcast %2 : vector<1x32xf32> to vector<8x32xf32>
    %23 = arith.mulf %21, %22 : vector<8x32xf32>
    %24 = vector.broadcast %3 : vector<1x32xf32> to vector<8x32xf32>
    %25 = arith.addf %23, %24 : vector<8x32xf32>
    %c0_10 = arith.constant 0 : index
    %c0_11 = arith.constant 0 : index
    %26 = vector.load %arg4[%c0_10, %c0_11] : memref<32x32xf32, #tpu.memory_space<vmem>>, vector<32x32xf32>
    %cst_12 = arith.constant dense<0.000000e+00> : vector<8x32xf32>
    %27 = tpu.matmul %25, %26, %cst_12 {dimension_numbers = #tpu.dot_dimension_numbers<[1], [0], [0], [1], [0, 0, 1, 1], [], []>} : vector<8x32xf32>, vector<32x32xf32>, vector<8x32xf32> -> vector<8x32xf32>
    %c0_13 = arith.constant 0 : index
    %c0_14 = arith.constant 0 : index
    %28 = vector.load %arg5[%c0_13, %c0_14] : memref<1x32xf32, #tpu.memory_space<vmem>>, vector<1x32xf32>
    %29 = vector.broadcast %28 : vector<1x32xf32> to vector<8x32xf32>
    %30 = arith.addf %27, %29 : vector<8x32xf32>
    %cst_15 = arith.constant 0.353553385 : f32
    %31 = vector.broadcast %cst_15 : f32 to vector<8x32xf32>
    %32 = arith.mulf %30, %31 : vector<8x32xf32>
    %c0_16 = arith.constant 0 : index
    %c0_17 = arith.constant 0 : index
    %33 = vector.load %arg6[%c0_16, %c0_17] : memref<32x32xf32, #tpu.memory_space<vmem>>, vector<32x32xf32>
    %cst_18 = arith.constant dense<0.000000e+00> : vector<8x32xf32>
    %34 = tpu.matmul %25, %33, %cst_18 {dimension_numbers = #tpu.dot_dimension_numbers<[1], [0], [0], [1], [0, 0, 1, 1], [], []>} : vector<8x32xf32>, vector<32x32xf32>, vector<8x32xf32> -> vector<8x32xf32>
    %c0_19 = arith.constant 0 : index
    %c0_20 = arith.constant 0 : index
    %35 = vector.load %arg7[%c0_19, %c0_20] : memref<1x32xf32, #tpu.memory_space<vmem>>, vector<1x32xf32>
    %36 = vector.broadcast %35 : vector<1x32xf32> to vector<8x32xf32>
    %37 = arith.addf %34, %36 : vector<8x32xf32>
    %c0_21 = arith.constant 0 : index
    %c0_22 = arith.constant 0 : index
    %38 = vector.load %arg8[%c0_21, %c0_22] : memref<32x32xf32, #tpu.memory_space<vmem>>, vector<32x32xf32>
    %cst_23 = arith.constant dense<0.000000e+00> : vector<8x32xf32>
    %39 = tpu.matmul %25, %38, %cst_23 {dimension_numbers = #tpu.dot_dimension_numbers<[1], [0], [0], [1], [0, 0, 1, 1], [], []>} : vector<8x32xf32>, vector<32x32xf32>, vector<8x32xf32> -> vector<8x32xf32>
    %c0_24 = arith.constant 0 : index
    %c0_25 = arith.constant 0 : index
    %40 = vector.load %arg9[%c0_24, %c0_25] : memref<1x32xf32, #tpu.memory_space<vmem>>, vector<1x32xf32>
    %41 = vector.broadcast %40 : vector<1x32xf32> to vector<8x32xf32>
    %42 = arith.addf %39, %41 : vector<8x32xf32>
    %c0_26 = arith.constant 0 : index
    %c0_27 = arith.constant 0 : index
    %43 = vector.load %arg10[%c0_26, %c0_27] : memref<32x32xf32, #tpu.memory_space<vmem>>, vector<32x32xf32>
    %c0_28 = arith.constant 0 : index
    %c0_29 = arith.constant 0 : index
    %44 = vector.load %arg11[%c0_28, %c0_29] : memref<1x32xf32, #tpu.memory_space<vmem>>, vector<1x32xf32>
    %cst_30 = arith.constant 0.000000e+00 : f32
    %45 = vector.broadcast %cst_30 : f32 to vector<8x32xf32>
    %46 = vector.extract_strided_slice %32 {offsets = [0, 0], sizes = [8, 8], strides = [1, 1]} : vector<8x32xf32> to vector<8x8xf32>
    %47 = vector.extract_strided_slice %37 {offsets = [0, 0], sizes = [8, 8], strides = [1, 1]} : vector<8x32xf32> to vector<8x8xf32>
    %cst_31 = arith.constant dense<0.000000e+00> : vector<8x8xf32>
    %48 = tpu.matmul %46, %47, %cst_31 {dimension_numbers = #tpu.dot_dimension_numbers<[1], [1], [0], [0], [0, 0, 1, 0], [], []>} : vector<8x8xf32>, vector<8x8xf32>, vector<8x8xf32> -> vector<8x8xf32>
    %cst_32 = arith.constant dense<0xFF800000> : vector<8xf32>
    %49 = vector.multi_reduction <maximumf>, %48, %cst_32 [1] : vector<8x8xf32> to vector<8xf32>
    %50 = vector.shape_cast %49 : vector<8xf32> to vector<8x1xf32>
    %51 = vector.broadcast %50 : vector<8x1xf32> to vector<8x8xf32>
    %52 = arith.subf %48, %51 : vector<8x8xf32>
    %53 = math.exp %52 : vector<8x8xf32>
    %cst_33 = arith.constant dense<0.000000e+00> : vector<8xf32>
    %54 = vector.multi_reduction <add>, %53, %cst_33 [1] : vector<8x8xf32> to vector<8xf32>
    %55 = vector.shape_cast %54 : vector<8xf32> to vector<8x1xf32>
    %56 = tpu.reciprocal %55 {approx = true} : vector<8x1xf32> -> vector<8x1xf32>
    %57 = vector.broadcast %56 : vector<8x1xf32> to vector<8x8xf32>
    %58 = arith.mulf %53, %57 : vector<8x8xf32>
    %59 = vector.extract_strided_slice %42 {offsets = [0, 0], sizes = [8, 8], strides = [1, 1]} : vector<8x32xf32> to vector<8x8xf32>
    %cst_34 = arith.constant dense<0.000000e+00> : vector<8x8xf32>
    %60 = tpu.matmul %58, %59, %cst_34 {dimension_numbers = #tpu.dot_dimension_numbers<[1], [0], [0], [1], [0, 0, 1, 1], [], []>} : vector<8x8xf32>, vector<8x8xf32>, vector<8x8xf32> -> vector<8x8xf32>
    %61 = vector.extract_strided_slice %43 {offsets = [0, 0], sizes = [8, 32], strides = [1, 1]} : vector<32x32xf32> to vector<8x32xf32>
    %cst_35 = arith.constant dense<0.000000e+00> : vector<8x32xf32>
    %62 = tpu.matmul %60, %61, %cst_35 {dimension_numbers = #tpu.dot_dimension_numbers<[1], [0], [0], [1], [0, 0, 1, 1], [], []>} : vector<8x8xf32>, vector<8x32xf32>, vector<8x32xf32> -> vector<8x32xf32>
    %63 = arith.addf %45, %62 : vector<8x32xf32>
    %64 = vector.extract_strided_slice %32 {offsets = [0, 8], sizes = [8, 8], strides = [1, 1]} : vector<8x32xf32> to vector<8x8xf32>
    %65 = vector.extract_strided_slice %37 {offsets = [0, 8], sizes = [8, 8], strides = [1, 1]} : vector<8x32xf32> to vector<8x8xf32>
    %cst_36 = arith.constant dense<0.000000e+00> : vector<8x8xf32>
    %66 = tpu.matmul %64, %65, %cst_36 {dimension_numbers = #tpu.dot_dimension_numbers<[1], [1], [0], [0], [0, 0, 1, 0], [], []>} : vector<8x8xf32>, vector<8x8xf32>, vector<8x8xf32> -> vector<8x8xf32>
    %cst_37 = arith.constant dense<0xFF800000> : vector<8xf32>
    %67 = vector.multi_reduction <maximumf>, %66, %cst_37 [1] : vector<8x8xf32> to vector<8xf32>
    %68 = vector.shape_cast %67 : vector<8xf32> to vector<8x1xf32>
    %69 = vector.broadcast %68 : vector<8x1xf32> to vector<8x8xf32>
    %70 = arith.subf %66, %69 : vector<8x8xf32>
    %71 = math.exp %70 : vector<8x8xf32>
    %cst_38 = arith.constant dense<0.000000e+00> : vector<8xf32>
    %72 = vector.multi_reduction <add>, %71, %cst_38 [1] : vector<8x8xf32> to vector<8xf32>
    %73 = vector.shape_cast %72 : vector<8xf32> to vector<8x1xf32>
    %74 = tpu.reciprocal %73 {approx = true} : vector<8x1xf32> -> vector<8x1xf32>
    %75 = vector.broadcast %74 : vector<8x1xf32> to vector<8x8xf32>
    %76 = arith.mulf %71, %75 : vector<8x8xf32>
    %77 = vector.extract_strided_slice %42 {offsets = [0, 8], sizes = [8, 8], strides = [1, 1]} : vector<8x32xf32> to vector<8x8xf32>
    %cst_39 = arith.constant dense<0.000000e+00> : vector<8x8xf32>
    %78 = tpu.matmul %76, %77, %cst_39 {dimension_numbers = #tpu.dot_dimension_numbers<[1], [0], [0], [1], [0, 0, 1, 1], [], []>} : vector<8x8xf32>, vector<8x8xf32>, vector<8x8xf32> -> vector<8x8xf32>
    %79 = vector.extract_strided_slice %43 {offsets = [8, 0], sizes = [8, 32], strides = [1, 1]} : vector<32x32xf32> to vector<8x32xf32>
    %cst_40 = arith.constant dense<0.000000e+00> : vector<8x32xf32>
    %80 = tpu.matmul %78, %79, %cst_40 {dimension_numbers = #tpu.dot_dimension_numbers<[1], [0], [0], [1], [0, 0, 1, 1], [], []>} : vector<8x8xf32>, vector<8x32xf32>, vector<8x32xf32> -> vector<8x32xf32>
    %81 = arith.addf %63, %80 : vector<8x32xf32>
    %82 = vector.extract_strided_slice %32 {offsets = [0, 16], sizes = [8, 8], strides = [1, 1]} : vector<8x32xf32> to vector<8x8xf32>
    %83 = vector.extract_strided_slice %37 {offsets = [0, 16], sizes = [8, 8], strides = [1, 1]} : vector<8x32xf32> to vector<8x8xf32>
    %cst_41 = arith.constant dense<0.000000e+00> : vector<8x8xf32>
    %84 = tpu.matmul %82, %83, %cst_41 {dimension_numbers = #tpu.dot_dimension_numbers<[1], [1], [0], [0], [0, 0, 1, 0], [], []>} : vector<8x8xf32>, vector<8x8xf32>, vector<8x8xf32> -> vector<8x8xf32>
    %cst_42 = arith.constant dense<0xFF800000> : vector<8xf32>
    %85 = vector.multi_reduction <maximumf>, %84, %cst_42 [1] : vector<8x8xf32> to vector<8xf32>
    %86 = vector.shape_cast %85 : vector<8xf32> to vector<8x1xf32>
    %87 = vector.broadcast %86 : vector<8x1xf32> to vector<8x8xf32>
    %88 = arith.subf %84, %87 : vector<8x8xf32>
    %89 = math.exp %88 : vector<8x8xf32>
    %cst_43 = arith.constant dense<0.000000e+00> : vector<8xf32>
    %90 = vector.multi_reduction <add>, %89, %cst_43 [1] : vector<8x8xf32> to vector<8xf32>
    %91 = vector.shape_cast %90 : vector<8xf32> to vector<8x1xf32>
    %92 = tpu.reciprocal %91 {approx = true} : vector<8x1xf32> -> vector<8x1xf32>
    %93 = vector.broadcast %92 : vector<8x1xf32> to vector<8x8xf32>
    %94 = arith.mulf %89, %93 : vector<8x8xf32>
    %95 = vector.extract_strided_slice %42 {offsets = [0, 16], sizes = [8, 8], strides = [1, 1]} : vector<8x32xf32> to vector<8x8xf32>
    %cst_44 = arith.constant dense<0.000000e+00> : vector<8x8xf32>
    %96 = tpu.matmul %94, %95, %cst_44 {dimension_numbers = #tpu.dot_dimension_numbers<[1], [0], [0], [1], [0, 0, 1, 1], [], []>} : vector<8x8xf32>, vector<8x8xf32>, vector<8x8xf32> -> vector<8x8xf32>
    %97 = vector.extract_strided_slice %43 {offsets = [16, 0], sizes = [8, 32], strides = [1, 1]} : vector<32x32xf32> to vector<8x32xf32>
    %cst_45 = arith.constant dense<0.000000e+00> : vector<8x32xf32>
    %98 = tpu.matmul %96, %97, %cst_45 {dimension_numbers = #tpu.dot_dimension_numbers<[1], [0], [0], [1], [0, 0, 1, 1], [], []>} : vector<8x8xf32>, vector<8x32xf32>, vector<8x32xf32> -> vector<8x32xf32>
    %99 = arith.addf %81, %98 : vector<8x32xf32>
    %100 = vector.extract_strided_slice %32 {offsets = [0, 24], sizes = [8, 8], strides = [1, 1]} : vector<8x32xf32> to vector<8x8xf32>
    %101 = vector.extract_strided_slice %37 {offsets = [0, 24], sizes = [8, 8], strides = [1, 1]} : vector<8x32xf32> to vector<8x8xf32>
    %cst_46 = arith.constant dense<0.000000e+00> : vector<8x8xf32>
    %102 = tpu.matmul %100, %101, %cst_46 {dimension_numbers = #tpu.dot_dimension_numbers<[1], [1], [0], [0], [0, 0, 1, 0], [], []>} : vector<8x8xf32>, vector<8x8xf32>, vector<8x8xf32> -> vector<8x8xf32>
    %cst_47 = arith.constant dense<0xFF800000> : vector<8xf32>
    %103 = vector.multi_reduction <maximumf>, %102, %cst_47 [1] : vector<8x8xf32> to vector<8xf32>
    %104 = vector.shape_cast %103 : vector<8xf32> to vector<8x1xf32>
    %105 = vector.broadcast %104 : vector<8x1xf32> to vector<8x8xf32>
    %106 = arith.subf %102, %105 : vector<8x8xf32>
    %107 = math.exp %106 : vector<8x8xf32>
    %cst_48 = arith.constant dense<0.000000e+00> : vector<8xf32>
    %108 = vector.multi_reduction <add>, %107, %cst_48 [1] : vector<8x8xf32> to vector<8xf32>
    %109 = vector.shape_cast %108 : vector<8xf32> to vector<8x1xf32>
    %110 = tpu.reciprocal %109 {approx = true} : vector<8x1xf32> -> vector<8x1xf32>
    %111 = vector.broadcast %110 : vector<8x1xf32> to vector<8x8xf32>
    %112 = arith.mulf %107, %111 : vector<8x8xf32>
    %113 = vector.extract_strided_slice %42 {offsets = [0, 24], sizes = [8, 8], strides = [1, 1]} : vector<8x32xf32> to vector<8x8xf32>
    %cst_49 = arith.constant dense<0.000000e+00> : vector<8x8xf32>
    %114 = tpu.matmul %112, %113, %cst_49 {dimension_numbers = #tpu.dot_dimension_numbers<[1], [0], [0], [1], [0, 0, 1, 1], [], []>} : vector<8x8xf32>, vector<8x8xf32>, vector<8x8xf32> -> vector<8x8xf32>
    %115 = vector.extract_strided_slice %43 {offsets = [24, 0], sizes = [8, 32], strides = [1, 1]} : vector<32x32xf32> to vector<8x32xf32>
    %cst_50 = arith.constant dense<0.000000e+00> : vector<8x32xf32>
    %116 = tpu.matmul %114, %115, %cst_50 {dimension_numbers = #tpu.dot_dimension_numbers<[1], [0], [0], [1], [0, 0, 1, 1], [], []>} : vector<8x8xf32>, vector<8x32xf32>, vector<8x32xf32> -> vector<8x32xf32>
    %117 = arith.addf %99, %116 : vector<8x32xf32>
    %118 = vector.broadcast %44 : vector<1x32xf32> to vector<8x32xf32>
    %119 = arith.addf %117, %118 : vector<8x32xf32>
    %120 = arith.addf %1, %119 : vector<8x32xf32>
    %c0_51 = arith.constant 0 : index
    %c0_52 = arith.constant 0 : index
    %c0_53 = arith.constant 0 : index
    %121 = vector.load %arg12[%c0_51, %c0_52, %c0_53] : memref<1x8x32xf32, #tpu.memory_space<vmem>>, vector<1x8x32xf32>
    %122 = vector.shape_cast %121 : vector<1x8x32xf32> to vector<8x32xf32>
    %123 = vector.shape_cast %120 : vector<8x32xf32> to vector<1x8x32xf32>
    tpu.vector_store %arg12[%c0_51, %c0_52, %c0_53], %123 {strides = array<i32>} : memref<1x8x32xf32, #tpu.memory_space<vmem>>, vector<1x8x32xf32>,
    return
  }
  func.func @transform_0(%arg0: i32) -> (i32, i32, i32) {
    %c0_i32 = arith.constant 0 : i32
    %c0_i32_0 = arith.constant 0 : i32
    %c0_i32_1 = arith.constant 0 : i32
    return %arg0, %c0_i32, %c0_i32_0 : i32, i32, i32
  }
  func.func @transform_1(%arg0: i32) -> (i32, i32) {
    %c0_i32 = arith.constant 0 : i32
    %c0_i32_0 = arith.constant 0 : i32
    %c0_i32_1 = arith.constant 0 : i32
    return %c0_i32, %c0_i32_0 : i32, i32
  }
  func.func @transform_2(%arg0: i32) -> (i32, i32) {
    %c0_i32 = arith.constant 0 : i32
    %c0_i32_0 = arith.constant 0 : i32
    %c0_i32_1 = arith.constant 0 : i32
    return %c0_i32, %c0_i32_0 : i32, i32
  }
  func.func @transform_3(%arg0: i32) -> (i32, i32) {
    %c0_i32 = arith.constant 0 : i32
    %c0_i32_0 = arith.constant 0 : i32
    %c0_i32_1 = arith.constant 0 : i32
    return %c0_i32, %c0_i32_0 : i32, i32
  }
  func.func @transform_4(%arg0: i32) -> (i32, i32) {
    %c0_i32 = arith.constant 0 : i32
    %c0_i32_0 = arith.constant 0 : i32
    %c0_i32_1 = arith.constant 0 : i32
    return %c0_i32, %c0_i32_0 : i32, i32
  }
  func.func @transform_5(%arg0: i32) -> (i32, i32) {
    %c0_i32 = arith.constant 0 : i32
    %c0_i32_0 = arith.constant 0 : i32
    %c0_i32_1 = arith.constant 0 : i32
    return %c0_i32, %c0_i32_0 : i32, i32
  }
  func.func @transform_6(%arg0: i32) -> (i32, i32) {
    %c0_i32 = arith.constant 0 : i32
    %c0_i32_0 = arith.constant 0 : i32
    %c0_i32_1 = arith.constant 0 : i32
    return %c0_i32, %c0_i32_0 : i32, i32
  }
  func.func @transform_7(%arg0: i32) -> (i32, i32) {
    %c0_i32 = arith.constant 0 : i32
    %c0_i32_0 = arith.constant 0 : i32
    %c0_i32_1 = arith.constant 0 : i32
    return %c0_i32, %c0_i32_0 : i32, i32
  }
  func.func @transform_8(%arg0: i32) -> (i32, i32) {
    %c0_i32 = arith.constant 0 : i32
    %c0_i32_0 = arith.constant 0 : i32
    %c0_i32_1 = arith.constant 0 : i32
    return %c0_i32, %c0_i32_0 : i32, i32
  }
  func.func @transform_9(%arg0: i32) -> (i32, i32) {
    %c0_i32 = arith.constant 0 : i32
    %c0_i32_0 = arith.constant 0 : i32
    %c0_i32_1 = arith.constant 0 : i32
    return %c0_i32, %c0_i32_0 : i32, i32
  }
  func.func @transform_10(%arg0: i32) -> (i32, i32) {
    %c0_i32 = arith.constant 0 : i32
    %c0_i32_0 = arith.constant 0 : i32
    %c0_i32_1 = arith.constant 0 : i32
    return %c0_i32, %c0_i32_0 : i32, i32
  }
  func.func @transform_11(%arg0: i32) -> (i32, i32, i32) {
    %c0_i32 = arith.constant 0 : i32
    %c0_i32_0 = arith.constant 0 : i32
    %c0_i32_1 = arith.constant 0 : i32
    return %arg0, %c0_i32, %c0_i32_0 : i32, i32, i32
  }
}

module attributes {stable_mosaic.version = 11 : i64} {
  func.func @_cross_attn_kernel(%arg0: i32, %arg1: memref<1x8x32xf32, #tpu.memory_space<vmem>>, %arg2: memref<1x12x48xf32, #tpu.memory_space<vmem>>, %arg3: memref<1x32xf32, #tpu.memory_space<vmem>>, %arg4: memref<1x32xf32, #tpu.memory_space<vmem>>, %arg5: memref<32x32xf32, #tpu.memory_space<vmem>>, %arg6: memref<1x32xf32, #tpu.memory_space<vmem>>, %arg7: memref<48x32xf32, #tpu.memory_space<vmem>>, %arg8: memref<1x32xf32, #tpu.memory_space<vmem>>, %arg9: memref<48x32xf32, #tpu.memory_space<vmem>>, %arg10: memref<1x32xf32, #tpu.memory_space<vmem>>, %arg11: memref<32x32xf32, #tpu.memory_space<vmem>>, %arg12: memref<1x32xf32, #tpu.memory_space<vmem>>, %arg13: memref<1x8x32xf32, #tpu.memory_space<vmem>>, %arg14: memref<1x8x12xf32, #tpu.memory_space<vmem>>) attributes {dimension_semantics = [#tpu.dimension_semantics<parallel>], iteration_bounds = array<i64: 2>, scalar_prefetch = 0 : i64, scratch_operands = 0 : i64, tpu.core_type = #tpu.core_type<tc>, window_params = [{transform_indices = @transform_0, window_bounds = array<i64: 1, 8, 32>}, {transform_indices = @transform_1, window_bounds = array<i64: 1, 12, 48>}, {pipeline_mode = #tpu.pipeline_mode<synchronous>, transform_indices = @transform_2, window_bounds = array<i64: 1, 32>}, {pipeline_mode = #tpu.pipeline_mode<synchronous>, transform_indices = @transform_3, window_bounds = array<i64: 1, 32>}, {pipeline_mode = #tpu.pipeline_mode<synchronous>, transform_indices = @transform_4, window_bounds = array<i64: 32, 32>}, {pipeline_mode = #tpu.pipeline_mode<synchronous>, transform_indices = @transform_5, window_bounds = array<i64: 1, 32>}, {pipeline_mode = #tpu.pipeline_mode<synchronous>, transform_indices = @transform_6, window_bounds = array<i64: 48, 32>}, {pipeline_mode = #tpu.pipeline_mode<synchronous>, transform_indices = @transform_7, window_bounds = array<i64: 1, 32>}, {pipeline_mode = #tpu.pipeline_mode<synchronous>, transform_indices = @transform_8, window_bounds = array<i64: 48, 32>}, {pipeline_mode = #tpu.pipeline_mode<synchronous>, transform_indices = @transform_9, window_bounds = array<i64: 1, 32>}, {pipeline_mode = #tpu.pipeline_mode<synchronous>, transform_indices = @transform_10, window_bounds = array<i64: 32, 32>}, {pipeline_mode = #tpu.pipeline_mode<synchronous>, transform_indices = @transform_11, window_bounds = array<i64: 1, 32>}, {transform_indices = @transform_12, window_bounds = array<i64: 1, 8, 32>}, {transform_indices = @transform_13, window_bounds = array<i64: 1, 8, 12>}]} {
    %c0 = arith.constant 0 : index
    %c0_0 = arith.constant 0 : index
    %c0_1 = arith.constant 0 : index
    %0 = vector.load %arg1[%c0, %c0_0, %c0_1] : memref<1x8x32xf32, #tpu.memory_space<vmem>>, vector<1x8x32xf32>
    %1 = vector.shape_cast %0 : vector<1x8x32xf32> to vector<8x32xf32>
    %c0_2 = arith.constant 0 : index
    %c0_3 = arith.constant 0 : index
    %c0_4 = arith.constant 0 : index
    %2 = vector.load %arg2[%c0_2, %c0_3, %c0_4] : memref<1x12x48xf32, #tpu.memory_space<vmem>>, vector<1x12x48xf32>
    %3 = vector.shape_cast %2 : vector<1x12x48xf32> to vector<12x48xf32>
    %c0_5 = arith.constant 0 : index
    %c0_6 = arith.constant 0 : index
    %4 = vector.load %arg3[%c0_5, %c0_6] : memref<1x32xf32, #tpu.memory_space<vmem>>, vector<1x32xf32>
    %c0_7 = arith.constant 0 : index
    %c0_8 = arith.constant 0 : index
    %5 = vector.load %arg4[%c0_7, %c0_8] : memref<1x32xf32, #tpu.memory_space<vmem>>, vector<1x32xf32>
    %cst = arith.constant dense<0.000000e+00> : vector<8xf32>
    %6 = vector.multi_reduction <add>, %1, %cst [1] : vector<8x32xf32> to vector<8xf32>
    %7 = vector.shape_cast %6 : vector<8xf32> to vector<8x1xf32>
    %cst_9 = arith.constant 3.200000e+01 : f32
    %8 = vector.broadcast %cst_9 : f32 to vector<8x1xf32>
    %9 = arith.divf %7, %8 : vector<8x1xf32>
    %10 = vector.broadcast %9 : vector<8x1xf32> to vector<8x32xf32>
    %11 = arith.subf %1, %10 : vector<8x32xf32>
    %12 = arith.mulf %11, %11 : vector<8x32xf32>
    %cst_10 = arith.constant dense<0.000000e+00> : vector<8xf32>
    %13 = vector.multi_reduction <add>, %12, %cst_10 [1] : vector<8x32xf32> to vector<8xf32>
    %14 = vector.shape_cast %13 : vector<8xf32> to vector<8x1xf32>
    %cst_11 = arith.constant 3.200000e+01 : f32
    %15 = vector.broadcast %cst_11 : f32 to vector<8x1xf32>
    %16 = arith.divf %14, %15 : vector<8x1xf32>
    %17 = vector.broadcast %9 : vector<8x1xf32> to vector<8x32xf32>
    %18 = arith.subf %1, %17 : vector<8x32xf32>
    %cst_12 = arith.constant 9.99999974E-6 : f32
    %19 = vector.broadcast %cst_12 : f32 to vector<8x1xf32>
    %20 = arith.addf %16, %19 : vector<8x1xf32>
    %21 = math.rsqrt %20 : vector<8x1xf32>
    %22 = vector.broadcast %21 : vector<8x1xf32> to vector<8x32xf32>
    %23 = arith.mulf %18, %22 : vector<8x32xf32>
    %24 = vector.broadcast %4 : vector<1x32xf32> to vector<8x32xf32>
    %25 = arith.mulf %23, %24 : vector<8x32xf32>
    %26 = vector.broadcast %5 : vector<1x32xf32> to vector<8x32xf32>
    %27 = arith.addf %25, %26 : vector<8x32xf32>
    %c0_13 = arith.constant 0 : index
    %c0_14 = arith.constant 0 : index
    %28 = vector.load %arg5[%c0_13, %c0_14] : memref<32x32xf32, #tpu.memory_space<vmem>>, vector<32x32xf32>
    %cst_15 = arith.constant dense<0.000000e+00> : vector<8x32xf32>
    %29 = tpu.matmul %27, %28, %cst_15 {dimension_numbers = #tpu.dot_dimension_numbers<[1], [0], [0], [1], [0, 0, 1, 1], [], []>} : vector<8x32xf32>, vector<32x32xf32>, vector<8x32xf32> -> vector<8x32xf32>
    %c0_16 = arith.constant 0 : index
    %c0_17 = arith.constant 0 : index
    %30 = vector.load %arg6[%c0_16, %c0_17] : memref<1x32xf32, #tpu.memory_space<vmem>>, vector<1x32xf32>
    %31 = vector.broadcast %30 : vector<1x32xf32> to vector<8x32xf32>
    %32 = arith.addf %29, %31 : vector<8x32xf32>
    %cst_18 = arith.constant 0.353553385 : f32
    %33 = vector.broadcast %cst_18 : f32 to vector<8x32xf32>
    %34 = arith.mulf %32, %33 : vector<8x32xf32>
    %c0_19 = arith.constant 0 : index
    %c0_20 = arith.constant 0 : index
    %35 = vector.load %arg7[%c0_19, %c0_20] : memref<48x32xf32, #tpu.memory_space<vmem>>, vector<48x32xf32>
    %cst_21 = arith.constant dense<0.000000e+00> : vector<12x32xf32>
    %36 = tpu.matmul %3, %35, %cst_21 {dimension_numbers = #tpu.dot_dimension_numbers<[1], [0], [0], [1], [0, 0, 1, 1], [], []>} : vector<12x48xf32>, vector<48x32xf32>, vector<12x32xf32> -> vector<12x32xf32>
    %c0_22 = arith.constant 0 : index
    %c0_23 = arith.constant 0 : index
    %37 = vector.load %arg8[%c0_22, %c0_23] : memref<1x32xf32, #tpu.memory_space<vmem>>, vector<1x32xf32>
    %38 = vector.broadcast %37 : vector<1x32xf32> to vector<12x32xf32>
    %39 = arith.addf %36, %38 : vector<12x32xf32>
    %c0_24 = arith.constant 0 : index
    %c0_25 = arith.constant 0 : index
    %40 = vector.load %arg9[%c0_24, %c0_25] : memref<48x32xf32, #tpu.memory_space<vmem>>, vector<48x32xf32>
    %cst_26 = arith.constant dense<0.000000e+00> : vector<12x32xf32>
    %41 = tpu.matmul %3, %40, %cst_26 {dimension_numbers = #tpu.dot_dimension_numbers<[1], [0], [0], [1], [0, 0, 1, 1], [], []>} : vector<12x48xf32>, vector<48x32xf32>, vector<12x32xf32> -> vector<12x32xf32>
    %c0_27 = arith.constant 0 : index
    %c0_28 = arith.constant 0 : index
    %42 = vector.load %arg10[%c0_27, %c0_28] : memref<1x32xf32, #tpu.memory_space<vmem>>, vector<1x32xf32>
    %43 = vector.broadcast %42 : vector<1x32xf32> to vector<12x32xf32>
    %44 = arith.addf %41, %43 : vector<12x32xf32>
    %c0_29 = arith.constant 0 : index
    %c0_30 = arith.constant 0 : index
    %45 = vector.load %arg11[%c0_29, %c0_30] : memref<32x32xf32, #tpu.memory_space<vmem>>, vector<32x32xf32>
    %c0_31 = arith.constant 0 : index
    %c0_32 = arith.constant 0 : index
    %46 = vector.load %arg12[%c0_31, %c0_32] : memref<1x32xf32, #tpu.memory_space<vmem>>, vector<1x32xf32>
    %cst_33 = arith.constant 0.000000e+00 : f32
    %47 = vector.broadcast %cst_33 : f32 to vector<8x32xf32>
    %cst_34 = arith.constant 0.000000e+00 : f32
    %48 = vector.broadcast %cst_34 : f32 to vector<8x12xf32>
    %49 = vector.extract_strided_slice %34 {offsets = [0, 0], sizes = [8, 8], strides = [1, 1]} : vector<8x32xf32> to vector<8x8xf32>
    %50 = vector.extract_strided_slice %39 {offsets = [0, 0], sizes = [12, 8], strides = [1, 1]} : vector<12x32xf32> to vector<12x8xf32>
    %cst_35 = arith.constant dense<0.000000e+00> : vector<8x12xf32>
    %51 = tpu.matmul %49, %50, %cst_35 {dimension_numbers = #tpu.dot_dimension_numbers<[1], [1], [0], [0], [0, 0, 1, 0], [], []>} : vector<8x8xf32>, vector<12x8xf32>, vector<8x12xf32> -> vector<8x12xf32>
    %cst_36 = arith.constant dense<0xFF800000> : vector<8xf32>
    %52 = vector.multi_reduction <maximumf>, %51, %cst_36 [1] : vector<8x12xf32> to vector<8xf32>
    %53 = vector.shape_cast %52 : vector<8xf32> to vector<8x1xf32>
    %54 = vector.broadcast %53 : vector<8x1xf32> to vector<8x12xf32>
    %55 = arith.subf %51, %54 : vector<8x12xf32>
    %56 = math.exp %55 : vector<8x12xf32>
    %cst_37 = arith.constant dense<0.000000e+00> : vector<8xf32>
    %57 = vector.multi_reduction <add>, %56, %cst_37 [1] : vector<8x12xf32> to vector<8xf32>
    %58 = vector.shape_cast %57 : vector<8xf32> to vector<8x1xf32>
    %59 = tpu.reciprocal %58 {approx = true} : vector<8x1xf32> -> vector<8x1xf32>
    %60 = vector.broadcast %59 : vector<8x1xf32> to vector<8x12xf32>
    %61 = arith.mulf %56, %60 : vector<8x12xf32>
    %62 = arith.addf %48, %61 : vector<8x12xf32>
    %63 = vector.extract_strided_slice %44 {offsets = [0, 0], sizes = [12, 8], strides = [1, 1]} : vector<12x32xf32> to vector<12x8xf32>
    %cst_38 = arith.constant dense<0.000000e+00> : vector<8x8xf32>
    %64 = tpu.matmul %61, %63, %cst_38 {dimension_numbers = #tpu.dot_dimension_numbers<[1], [0], [0], [1], [0, 0, 1, 1], [], []>} : vector<8x12xf32>, vector<12x8xf32>, vector<8x8xf32> -> vector<8x8xf32>
    %65 = vector.extract_strided_slice %45 {offsets = [0, 0], sizes = [8, 32], strides = [1, 1]} : vector<32x32xf32> to vector<8x32xf32>
    %cst_39 = arith.constant dense<0.000000e+00> : vector<8x32xf32>
    %66 = tpu.matmul %64, %65, %cst_39 {dimension_numbers = #tpu.dot_dimension_numbers<[1], [0], [0], [1], [0, 0, 1, 1], [], []>} : vector<8x8xf32>, vector<8x32xf32>, vector<8x32xf32> -> vector<8x32xf32>
    %67 = arith.addf %47, %66 : vector<8x32xf32>
    %68 = vector.extract_strided_slice %34 {offsets = [0, 8], sizes = [8, 8], strides = [1, 1]} : vector<8x32xf32> to vector<8x8xf32>
    %69 = vector.extract_strided_slice %39 {offsets = [0, 8], sizes = [12, 8], strides = [1, 1]} : vector<12x32xf32> to vector<12x8xf32>
    %cst_40 = arith.constant dense<0.000000e+00> : vector<8x12xf32>
    %70 = tpu.matmul %68, %69, %cst_40 {dimension_numbers = #tpu.dot_dimension_numbers<[1], [1], [0], [0], [0, 0, 1, 0], [], []>} : vector<8x8xf32>, vector<12x8xf32>, vector<8x12xf32> -> vector<8x12xf32>
    %cst_41 = arith.constant dense<0xFF800000> : vector<8xf32>
    %71 = vector.multi_reduction <maximumf>, %70, %cst_41 [1] : vector<8x12xf32> to vector<8xf32>
    %72 = vector.shape_cast %71 : vector<8xf32> to vector<8x1xf32>
    %73 = vector.broadcast %72 : vector<8x1xf32> to vector<8x12xf32>
    %74 = arith.subf %70, %73 : vector<8x12xf32>
    %75 = math.exp %74 : vector<8x12xf32>
    %cst_42 = arith.constant dense<0.000000e+00> : vector<8xf32>
    %76 = vector.multi_reduction <add>, %75, %cst_42 [1] : vector<8x12xf32> to vector<8xf32>
    %77 = vector.shape_cast %76 : vector<8xf32> to vector<8x1xf32>
    %78 = tpu.reciprocal %77 {approx = true} : vector<8x1xf32> -> vector<8x1xf32>
    %79 = vector.broadcast %78 : vector<8x1xf32> to vector<8x12xf32>
    %80 = arith.mulf %75, %79 : vector<8x12xf32>
    %81 = arith.addf %62, %80 : vector<8x12xf32>
    %82 = vector.extract_strided_slice %44 {offsets = [0, 8], sizes = [12, 8], strides = [1, 1]} : vector<12x32xf32> to vector<12x8xf32>
    %cst_43 = arith.constant dense<0.000000e+00> : vector<8x8xf32>
    %83 = tpu.matmul %80, %82, %cst_43 {dimension_numbers = #tpu.dot_dimension_numbers<[1], [0], [0], [1], [0, 0, 1, 1], [], []>} : vector<8x12xf32>, vector<12x8xf32>, vector<8x8xf32> -> vector<8x8xf32>
    %84 = vector.extract_strided_slice %45 {offsets = [8, 0], sizes = [8, 32], strides = [1, 1]} : vector<32x32xf32> to vector<8x32xf32>
    %cst_44 = arith.constant dense<0.000000e+00> : vector<8x32xf32>
    %85 = tpu.matmul %83, %84, %cst_44 {dimension_numbers = #tpu.dot_dimension_numbers<[1], [0], [0], [1], [0, 0, 1, 1], [], []>} : vector<8x8xf32>, vector<8x32xf32>, vector<8x32xf32> -> vector<8x32xf32>
    %86 = arith.addf %67, %85 : vector<8x32xf32>
    %87 = vector.extract_strided_slice %34 {offsets = [0, 16], sizes = [8, 8], strides = [1, 1]} : vector<8x32xf32> to vector<8x8xf32>
    %88 = vector.extract_strided_slice %39 {offsets = [0, 16], sizes = [12, 8], strides = [1, 1]} : vector<12x32xf32> to vector<12x8xf32>
    %cst_45 = arith.constant dense<0.000000e+00> : vector<8x12xf32>
    %89 = tpu.matmul %87, %88, %cst_45 {dimension_numbers = #tpu.dot_dimension_numbers<[1], [1], [0], [0], [0, 0, 1, 0], [], []>} : vector<8x8xf32>, vector<12x8xf32>, vector<8x12xf32> -> vector<8x12xf32>
    %cst_46 = arith.constant dense<0xFF800000> : vector<8xf32>
    %90 = vector.multi_reduction <maximumf>, %89, %cst_46 [1] : vector<8x12xf32> to vector<8xf32>
    %91 = vector.shape_cast %90 : vector<8xf32> to vector<8x1xf32>
    %92 = vector.broadcast %91 : vector<8x1xf32> to vector<8x12xf32>
    %93 = arith.subf %89, %92 : vector<8x12xf32>
    %94 = math.exp %93 : vector<8x12xf32>
    %cst_47 = arith.constant dense<0.000000e+00> : vector<8xf32>
    %95 = vector.multi_reduction <add>, %94, %cst_47 [1] : vector<8x12xf32> to vector<8xf32>
    %96 = vector.shape_cast %95 : vector<8xf32> to vector<8x1xf32>
    %97 = tpu.reciprocal %96 {approx = true} : vector<8x1xf32> -> vector<8x1xf32>
    %98 = vector.broadcast %97 : vector<8x1xf32> to vector<8x12xf32>
    %99 = arith.mulf %94, %98 : vector<8x12xf32>
    %100 = arith.addf %81, %99 : vector<8x12xf32>
    %101 = vector.extract_strided_slice %44 {offsets = [0, 16], sizes = [12, 8], strides = [1, 1]} : vector<12x32xf32> to vector<12x8xf32>
    %cst_48 = arith.constant dense<0.000000e+00> : vector<8x8xf32>
    %102 = tpu.matmul %99, %101, %cst_48 {dimension_numbers = #tpu.dot_dimension_numbers<[1], [0], [0], [1], [0, 0, 1, 1], [], []>} : vector<8x12xf32>, vector<12x8xf32>, vector<8x8xf32> -> vector<8x8xf32>
    %103 = vector.extract_strided_slice %45 {offsets = [16, 0], sizes = [8, 32], strides = [1, 1]} : vector<32x32xf32> to vector<8x32xf32>
    %cst_49 = arith.constant dense<0.000000e+00> : vector<8x32xf32>
    %104 = tpu.matmul %102, %103, %cst_49 {dimension_numbers = #tpu.dot_dimension_numbers<[1], [0], [0], [1], [0, 0, 1, 1], [], []>} : vector<8x8xf32>, vector<8x32xf32>, vector<8x32xf32> -> vector<8x32xf32>
    %105 = arith.addf %86, %104 : vector<8x32xf32>
    %106 = vector.extract_strided_slice %34 {offsets = [0, 24], sizes = [8, 8], strides = [1, 1]} : vector<8x32xf32> to vector<8x8xf32>
    %107 = vector.extract_strided_slice %39 {offsets = [0, 24], sizes = [12, 8], strides = [1, 1]} : vector<12x32xf32> to vector<12x8xf32>
    %cst_50 = arith.constant dense<0.000000e+00> : vector<8x12xf32>
    %108 = tpu.matmul %106, %107, %cst_50 {dimension_numbers = #tpu.dot_dimension_numbers<[1], [1], [0], [0], [0, 0, 1, 0], [], []>} : vector<8x8xf32>, vector<12x8xf32>, vector<8x12xf32> -> vector<8x12xf32>
    %cst_51 = arith.constant dense<0xFF800000> : vector<8xf32>
    %109 = vector.multi_reduction <maximumf>, %108, %cst_51 [1] : vector<8x12xf32> to vector<8xf32>
    %110 = vector.shape_cast %109 : vector<8xf32> to vector<8x1xf32>
    %111 = vector.broadcast %110 : vector<8x1xf32> to vector<8x12xf32>
    %112 = arith.subf %108, %111 : vector<8x12xf32>
    %113 = math.exp %112 : vector<8x12xf32>
    %cst_52 = arith.constant dense<0.000000e+00> : vector<8xf32>
    %114 = vector.multi_reduction <add>, %113, %cst_52 [1] : vector<8x12xf32> to vector<8xf32>
    %115 = vector.shape_cast %114 : vector<8xf32> to vector<8x1xf32>
    %116 = tpu.reciprocal %115 {approx = true} : vector<8x1xf32> -> vector<8x1xf32>
    %117 = vector.broadcast %116 : vector<8x1xf32> to vector<8x12xf32>
    %118 = arith.mulf %113, %117 : vector<8x12xf32>
    %119 = arith.addf %100, %118 : vector<8x12xf32>
    %120 = vector.extract_strided_slice %44 {offsets = [0, 24], sizes = [12, 8], strides = [1, 1]} : vector<12x32xf32> to vector<12x8xf32>
    %cst_53 = arith.constant dense<0.000000e+00> : vector<8x8xf32>
    %121 = tpu.matmul %118, %120, %cst_53 {dimension_numbers = #tpu.dot_dimension_numbers<[1], [0], [0], [1], [0, 0, 1, 1], [], []>} : vector<8x12xf32>, vector<12x8xf32>, vector<8x8xf32> -> vector<8x8xf32>
    %122 = vector.extract_strided_slice %45 {offsets = [24, 0], sizes = [8, 32], strides = [1, 1]} : vector<32x32xf32> to vector<8x32xf32>
    %cst_54 = arith.constant dense<0.000000e+00> : vector<8x32xf32>
    %123 = tpu.matmul %121, %122, %cst_54 {dimension_numbers = #tpu.dot_dimension_numbers<[1], [0], [0], [1], [0, 0, 1, 1], [], []>} : vector<8x8xf32>, vector<8x32xf32>, vector<8x32xf32> -> vector<8x32xf32>
    %124 = arith.addf %105, %123 : vector<8x32xf32>
    %125 = vector.broadcast %46 : vector<1x32xf32> to vector<8x32xf32>
    %126 = arith.addf %124, %125 : vector<8x32xf32>
    %127 = arith.addf %1, %126 : vector<8x32xf32>
    %c0_55 = arith.constant 0 : index
    %c0_56 = arith.constant 0 : index
    %c0_57 = arith.constant 0 : index
    %128 = vector.load %arg13[%c0_55, %c0_56, %c0_57] : memref<1x8x32xf32, #tpu.memory_space<vmem>>, vector<1x8x32xf32>
    %129 = vector.shape_cast %128 : vector<1x8x32xf32> to vector<8x32xf32>
    %130 = vector.shape_cast %127 : vector<8x32xf32> to vector<1x8x32xf32>
    tpu.vector_store %arg13[%c0_55, %c0_56, %c0_57], %130 {strides = array<i32>} : memref<1x8x32xf32, #tpu.memory_space<vmem>>, vector<1x8x32xf32>,
    %cst_58 = arith.constant 2.500000e-01 : f32
    %131 = vector.broadcast %cst_58 : f32 to vector<8x12xf32>
    %132 = arith.mulf %119, %131 : vector<8x12xf32>
    %c0_59 = arith.constant 0 : index
    %c0_60 = arith.constant 0 : index
    %c0_61 = arith.constant 0 : index
    %133 = vector.load %arg14[%c0_59, %c0_60, %c0_61] : memref<1x8x12xf32, #tpu.memory_space<vmem>>, vector<1x8x12xf32>
    %134 = vector.shape_cast %133 : vector<1x8x12xf32> to vector<8x12xf32>
    %135 = vector.shape_cast %132 : vector<8x12xf32> to vector<1x8x12xf32>
    tpu.vector_store %arg14[%c0_59, %c0_60, %c0_61], %135 {strides = array<i32>} : memref<1x8x12xf32, #tpu.memory_space<vmem>>, vector<1x8x12xf32>,
    return
  }
  func.func @transform_0(%arg0: i32) -> (i32, i32, i32) {
    %c0_i32 = arith.constant 0 : i32
    %c0_i32_0 = arith.constant 0 : i32
    %c0_i32_1 = arith.constant 0 : i32
    return %arg0, %c0_i32, %c0_i32_0 : i32, i32, i32
  }
  func.func @transform_1(%arg0: i32) -> (i32, i32, i32) {
    %c0_i32 = arith.constant 0 : i32
    %c0_i32_0 = arith.constant 0 : i32
    %c0_i32_1 = arith.constant 0 : i32
    return %arg0, %c0_i32, %c0_i32_0 : i32, i32, i32
  }
  func.func @transform_2(%arg0: i32) -> (i32, i32) {
    %c0_i32 = arith.constant 0 : i32
    %c0_i32_0 = arith.constant 0 : i32
    %c0_i32_1 = arith.constant 0 : i32
    return %c0_i32, %c0_i32_0 : i32, i32
  }
  func.func @transform_3(%arg0: i32) -> (i32, i32) {
    %c0_i32 = arith.constant 0 : i32
    %c0_i32_0 = arith.constant 0 : i32
    %c0_i32_1 = arith.constant 0 : i32
    return %c0_i32, %c0_i32_0 : i32, i32
  }
  func.func @transform_4(%arg0: i32) -> (i32, i32) {
    %c0_i32 = arith.constant 0 : i32
    %c0_i32_0 = arith.constant 0 : i32
    %c0_i32_1 = arith.constant 0 : i32
    return %c0_i32, %c0_i32_0 : i32, i32
  }
  func.func @transform_5(%arg0: i32) -> (i32, i32) {
    %c0_i32 = arith.constant 0 : i32
    %c0_i32_0 = arith.constant 0 : i32
    %c0_i32_1 = arith.constant 0 : i32
    return %c0_i32, %c0_i32_0 : i32, i32
  }
  func.func @transform_6(%arg0: i32) -> (i32, i32) {
    %c0_i32 = arith.constant 0 : i32
    %c0_i32_0 = arith.constant 0 : i32
    %c0_i32_1 = arith.constant 0 : i32
    return %c0_i32, %c0_i32_0 : i32, i32
  }
  func.func @transform_7(%arg0: i32) -> (i32, i32) {
    %c0_i32 = arith.constant 0 : i32
    %c0_i32_0 = arith.constant 0 : i32
    %c0_i32_1 = arith.constant 0 : i32
    return %c0_i32, %c0_i32_0 : i32, i32
  }
  func.func @transform_8(%arg0: i32) -> (i32, i32) {
    %c0_i32 = arith.constant 0 : i32
    %c0_i32_0 = arith.constant 0 : i32
    %c0_i32_1 = arith.constant 0 : i32
    return %c0_i32, %c0_i32_0 : i32, i32
  }
  func.func @transform_9(%arg0: i32) -> (i32, i32) {
    %c0_i32 = arith.constant 0 : i32
    %c0_i32_0 = arith.constant 0 : i32
    %c0_i32_1 = arith.constant 0 : i32
    return %c0_i32, %c0_i32_0 : i32, i32
  }
  func.func @transform_10(%arg0: i32) -> (i32, i32) {
    %c0_i32 = arith.constant 0 : i32
    %c0_i32_0 = arith.constant 0 : i32
    %c0_i32_1 = arith.constant 0 : i32
    return %c0_i32, %c0_i32_0 : i32, i32
  }
  func.func @transform_11(%arg0: i32) -> (i32, i32) {
    %c0_i32 = arith.constant 0 : i32
    %c0_i32_0 = arith.constant 0 : i32
    %c0_i32_1 = arith.constant 0 : i32
    return %c0_i32, %c0_i32_0 : i32, i32
  }
  func.func @transform_12(%arg0: i32) -> (i32, i32, i32) {
    %c0_i32 = arith.constant 0 : i32
    %c0_i32_0 = arith.constant 0 : i32
    %c0_i32_1 = arith.constant 0 : i32
    return %arg0, %c0_i32, %c0_i32_0 : i32, i32, i32
  }
  func.func @transform_13(%arg0: i32) -> (i32, i32, i32) {
    %c0_i32 = arith.constant 0 : i32
    %c0_i32_0 = arith.constant 0 : i32
    %c0_i32_1 = arith.constant 0 : i32
    return %arg0, %c0_i32, %c0_i32_0 : i32, i32, i32
  }
}

module attributes {stable_mosaic.version = 11 : i64} {
  func.func @_ffn_kernel(%arg0: i32, %arg1: memref<16x32xf32, #tpu.memory_space<vmem>>, %arg2: memref<1x32xf32, #tpu.memory_space<vmem>>, %arg3: memref<1x32xf32, #tpu.memory_space<vmem>>, %arg4: memref<32x64xf32, #tpu.memory_space<vmem>>, %arg5: memref<1x64xf32, #tpu.memory_space<vmem>>, %arg6: memref<64x32xf32, #tpu.memory_space<vmem>>, %arg7: memref<1x32xf32, #tpu.memory_space<vmem>>, %arg8: memref<16x32xf32, #tpu.memory_space<vmem>>) attributes {dimension_semantics = [#tpu.dimension_semantics<parallel>], iteration_bounds = array<i64: 1>, scalar_prefetch = 0 : i64, scratch_operands = 0 : i64, tpu.core_type = #tpu.core_type<tc>, window_params = [{transform_indices = @transform_0, window_bounds = array<i64: 16, 32>}, {pipeline_mode = #tpu.pipeline_mode<synchronous>, transform_indices = @transform_1, window_bounds = array<i64: 1, 32>}, {pipeline_mode = #tpu.pipeline_mode<synchronous>, transform_indices = @transform_2, window_bounds = array<i64: 1, 32>}, {pipeline_mode = #tpu.pipeline_mode<synchronous>, transform_indices = @transform_3, window_bounds = array<i64: 32, 64>}, {pipeline_mode = #tpu.pipeline_mode<synchronous>, transform_indices = @transform_4, window_bounds = array<i64: 1, 64>}, {pipeline_mode = #tpu.pipeline_mode<synchronous>, transform_indices = @transform_5, window_bounds = array<i64: 64, 32>}, {pipeline_mode = #tpu.pipeline_mode<synchronous>, transform_indices = @transform_6, window_bounds = array<i64: 1, 32>}, {transform_indices = @transform_7, window_bounds = array<i64: 16, 32>}]} {
    %c0 = arith.constant 0 : index
    %c0_0 = arith.constant 0 : index
    %0 = vector.load %arg1[%c0, %c0_0] : memref<16x32xf32, #tpu.memory_space<vmem>>, vector<16x32xf32>
    %c0_1 = arith.constant 0 : index
    %c0_2 = arith.constant 0 : index
    %1 = vector.load %arg2[%c0_1, %c0_2] : memref<1x32xf32, #tpu.memory_space<vmem>>, vector<1x32xf32>
    %c0_3 = arith.constant 0 : index
    %c0_4 = arith.constant 0 : index
    %2 = vector.load %arg3[%c0_3, %c0_4] : memref<1x32xf32, #tpu.memory_space<vmem>>, vector<1x32xf32>
    %cst = arith.constant dense<0.000000e+00> : vector<16xf32>
    %3 = vector.multi_reduction <add>, %0, %cst [1] : vector<16x32xf32> to vector<16xf32>
    %4 = vector.shape_cast %3 : vector<16xf32> to vector<16x1xf32>
    %cst_5 = arith.constant 3.200000e+01 : f32
    %5 = vector.broadcast %cst_5 : f32 to vector<16x1xf32>
    %6 = arith.divf %4, %5 : vector<16x1xf32>
    %7 = vector.broadcast %6 : vector<16x1xf32> to vector<16x32xf32>
    %8 = arith.subf %0, %7 : vector<16x32xf32>
    %9 = arith.mulf %8, %8 : vector<16x32xf32>
    %cst_6 = arith.constant dense<0.000000e+00> : vector<16xf32>
    %10 = vector.multi_reduction <add>, %9, %cst_6 [1] : vector<16x32xf32> to vector<16xf32>
    %11 = vector.shape_cast %10 : vector<16xf32> to vector<16x1xf32>
    %cst_7 = arith.constant 3.200000e+01 : f32
    %12 = vector.broadcast %cst_7 : f32 to vector<16x1xf32>
    %13 = arith.divf %11, %12 : vector<16x1xf32>
    %14 = vector.broadcast %6 : vector<16x1xf32> to vector<16x32xf32>
    %15 = arith.subf %0, %14 : vector<16x32xf32>
    %cst_8 = arith.constant 9.99999974E-6 : f32
    %16 = vector.broadcast %cst_8 : f32 to vector<16x1xf32>
    %17 = arith.addf %13, %16 : vector<16x1xf32>
    %18 = math.rsqrt %17 : vector<16x1xf32>
    %19 = vector.broadcast %18 : vector<16x1xf32> to vector<16x32xf32>
    %20 = arith.mulf %15, %19 : vector<16x32xf32>
    %21 = vector.broadcast %1 : vector<1x32xf32> to vector<16x32xf32>
    %22 = arith.mulf %20, %21 : vector<16x32xf32>
    %23 = vector.broadcast %2 : vector<1x32xf32> to vector<16x32xf32>
    %24 = arith.addf %22, %23 : vector<16x32xf32>
    %c0_9 = arith.constant 0 : index
    %c0_10 = arith.constant 0 : index
    %25 = vector.load %arg4[%c0_9, %c0_10] : memref<32x64xf32, #tpu.memory_space<vmem>>, vector<32x64xf32>
    %cst_11 = arith.constant dense<0.000000e+00> : vector<16x64xf32>
    %26 = tpu.matmul %24, %25, %cst_11 {dimension_numbers = #tpu.dot_dimension_numbers<[1], [0], [0], [1], [0, 0, 1, 1], [], []>} : vector<16x32xf32>, vector<32x64xf32>, vector<16x64xf32> -> vector<16x64xf32>
    %c0_12 = arith.constant 0 : index
    %c0_13 = arith.constant 0 : index
    %27 = vector.load %arg5[%c0_12, %c0_13] : memref<1x64xf32, #tpu.memory_space<vmem>>, vector<1x64xf32>
    %28 = vector.broadcast %27 : vector<1x64xf32> to vector<16x64xf32>
    %29 = arith.addf %26, %28 : vector<16x64xf32>
    %cst_14 = arith.constant 0.000000e+00 : f32
    %30 = vector.broadcast %cst_14 : f32 to vector<16x64xf32>
    %31 = arith.maximumf %29, %30 : vector<16x64xf32>
    %c0_15 = arith.constant 0 : index
    %c0_16 = arith.constant 0 : index
    %32 = vector.load %arg6[%c0_15, %c0_16] : memref<64x32xf32, #tpu.memory_space<vmem>>, vector<64x32xf32>
    %cst_17 = arith.constant dense<0.000000e+00> : vector<16x32xf32>
    %33 = tpu.matmul %31, %32, %cst_17 {dimension_numbers = #tpu.dot_dimension_numbers<[1], [0], [0], [1], [0, 0, 1, 1], [], []>} : vector<16x64xf32>, vector<64x32xf32>, vector<16x32xf32> -> vector<16x32xf32>
    %c0_18 = arith.constant 0 : index
    %c0_19 = arith.constant 0 : index
    %34 = vector.load %arg7[%c0_18, %c0_19] : memref<1x32xf32, #tpu.memory_space<vmem>>, vector<1x32xf32>
    %35 = vector.broadcast %34 : vector<1x32xf32> to vector<16x32xf32>
    %36 = arith.addf %33, %35 : vector<16x32xf32>
    %37 = arith.addf %0, %36 : vector<16x32xf32>
    %c0_20 = arith.constant 0 : index
    %c0_21 = arith.constant 0 : index
    %38 = vector.load %arg8[%c0_20, %c0_21] : memref<16x32xf32, #tpu.memory_space<vmem>>, vector<16x32xf32>
    tpu.vector_store %arg8[%c0_20, %c0_21], %37 {strides = array<i32>} : memref<16x32xf32, #tpu.memory_space<vmem>>, vector<16x32xf32>,
    return
  }
  func.func @transform_0(%arg0: i32) -> (i32, i32) {
    %c0_i32 = arith.constant 0 : i32
    %c0_i32_0 = arith.constant 0 : i32
    return %arg0, %c0_i32 : i32, i32
  }
  func.func @transform_1(%arg0: i32) -> (i32, i32) {
    %c0_i32 = arith.constant 0 : i32
    %c0_i32_0 = arith.constant 0 : i32
    %c0_i32_1 = arith.constant 0 : i32
    return %c0_i32, %c0_i32_0 : i32, i32
  }
  func.func @transform_2(%arg0: i32) -> (i32, i32) {
    %c0_i32 = arith.constant 0 : i32
    %c0_i32_0 = arith.constant 0 : i32
    %c0_i32_1 = arith.constant 0 : i32
    return %c0_i32, %c0_i32_0 : i32, i32
  }
  func.func @transform_3(%arg0: i32) -> (i32, i32) {
    %c0_i32 = arith.constant 0 : i32
    %c0_i32_0 = arith.constant 0 : i32
    %c0_i32_1 = arith.constant 0 : i32
    return %c0_i32, %c0_i32_0 : i32, i32
  }
  func.func @transform_4(%arg0: i32) -> (i32, i32) {
    %c0_i32 = arith.constant 0 : i32
    %c0_i32_0 = arith.constant 0 : i32
    %c0_i32_1 = arith.constant 0 : i32
    return %c0_i32, %c0_i32_0 : i32, i32
  }
  func.func @transform_5(%arg0: i32) -> (i32, i32) {
    %c0_i32 = arith.constant 0 : i32
    %c0_i32_0 = arith.constant 0 : i32
    %c0_i32_1 = arith.constant 0 : i32
    return %c0_i32, %c0_i32_0 : i32, i32
  }
  func.func @transform_6(%arg0: i32) -> (i32, i32) {
    %c0_i32 = arith.constant 0 : i32
    %c0_i32_0 = arith.constant 0 : i32
    %c0_i32_1 = arith.constant 0 : i32
    return %c0_i32, %c0_i32_0 : i32, i32
  }
  func.func @transform_7(%arg0: i32) -> (i32, i32) {
    %c0_i32 = arith.constant 0 : i32
    %c0_i32_0 = arith.constant 0 : i32
    return %arg0, %c0_i32 : i32, i32
  }
}

</mosaic_0001>

<bundles_post_ra>
// kernel: transformer_decoder_layer.5
= control target key start
LH: loop header
LB: loop body
LE: loop exit
PB: predicated region body
PF: predicated region fallthrough
CT: control target
= control target key end

     0   :  { %vm30_vm0 = vcmask 261120   ;;  %v208_v4 = vmov 32.0   ;;  %vm143_vm8 = vcmask 523264   ;;  %s337_s0 = inlined_call_operand.vmem [shape: f32[16,32], index: 0, kind: input, shape index: {}]   ;;  %s338_s1 = inlined_call_operand.vmem [shape: f32[1,32], index: 1, kind: input, shape index: {}]   ;;  %s339_s2 = inlined_call_operand.vmem [shape: f32[1,32], index: 2, kind: input, shape index: {}]   ;;  %s340_s4 = inlined_call_operand.vmem [shape: f32[1,64], index: 4, kind: input, shape index: {}]   ;;  %s341_s3 = inlined_call_operand.vmem [shape: f32[32,64], index: 3, kind: input, shape index: {}]   ;;  %s342_s5 = inlined_call_operand.vmem [shape: f32[64,32], index: 5, kind: input, shape index: {}]   ;;  %s343_s6 = inlined_call_operand.vmem [shape: f32[1,32], index: 6, kind: input, shape index: {}]   ;;  %s344_s7 = inlined_call_operand.vmem [shape: f32[16,32], index: 7, kind: output, shape index: {}]  }
   0x1   :  { %v252_v0 = vld [vmem:[%s337_s0 + $0x8] sm:$0xff]  ;;  %v259_v2 = vld [vmem:[%s337_s0] sm:$0xff]  ;;  %202 = vrcp.f32 %v208_v4  ;;  %v95_v21 = vld [vmem:[%s341_s3 + $0x18] sm:$0xff] }
   0x2   :  { %v34_v1 = vsel %vm30_vm0, %v252_v0, 0.0  ;;  %v31_v3 = vsel %vm30_vm0, %v259_v2, 0.0  ;;  %185 = vmatpush.msra.mxu3 %v95_v21  ;;  %118 = vmatpush.msra.mxu0 %v95_v21  ;;  %v94_v22 = vld [vmem:[%s341_s3 + $0x10] sm:$0xff]  ;;  %v93_v23 = vld [vmem:[%s341_s3 + $0x8] sm:$0xff]  ;;  %v92_v24 = vld [vmem:[%s341_s3] sm:$0xff] }
   0x3   :  { %35 = vadd.xlane.f32.xlu0 %v34_v1  ;;  %v138_v28 = vld [vmem:[%s342_s5 + $0x38] sm:$0xff]  ;;  %v137_v29 = vld [vmem:[%s342_s5 + $0x30] sm:$0xff]  ;;  %v136_v30 = vld [vmem:[%s342_s5 + $0x28] sm:$0xff] }
   0x4   :  { %186 = vmatpush.msra.mxu3 %v94_v22  ;;  %119 = vmatpush.msra.mxu0 %v94_v22  ;;  %v135_v33 = vld [vmem:[%s342_s5 + $0x20] sm:$0xff]  ;;  %v134_v36 = vld [vmem:[%s342_s5 + $0x18] sm:$0xff]  ;;  %v133_v58 = vld [vmem:[%s342_s5 + $0x10] sm:$0xff] }
   0x5   :  { %189 = vmatpush.msra.mxu2 %v138_v28  ;;  %158 = vmatpush.msra.mxu1 %v138_v28  ;;  %v198_v44 = vld [vmem:[%s338_s1] ss:$0 sm:$0xff]  ;;  %v132_v59 = vld [vmem:[%s342_s5 + $0x8] sm:$0xff] }
   0x6   :  { %187 = vmatpush.msra.mxu3 %v93_v23  ;;  %120 = vmatpush.msra.mxu0 %v93_v23  ;;  %v199_v48 = vld [vmem:[%s339_s2] ss:$0 sm:$0xff] }
   0x7   :  { %v203_v5 = vpop.eup %202  ;;  %190 = vmatpush.msra.mxu2 %v137_v29  ;;  %159 = vmatpush.msra.mxu1 %v137_v29  ;;  %v131_v60 = vld [vmem:[%s342_s5] sm:$0xff] }
   0x8   :  { %v38_v6 = vmul.f32 32.0, %v203_v5  ;;  %vm42_vm1 = vweird.f32 %v203_v5  ;;  %188 = vmatpush.msra.mxu3 %v92_v24  ;;  %121 = vmatpush.msra.mxu0 %v92_v24  ;;  %v200_v61 = vld [vmem:[%s340_s4] ss:$0 sm:$0xff] }
   0x9   :  { %191 = vmatpush.msra.mxu2 %v136_v30  ;;  %160 = vmatpush.msra.mxu1 %v136_v30 }
   0xa   :  { %v39_v7 = vsub.f32 1.0, %v38_v6  ;;  %v201_v6 = vld [vmem:[%s343_s6] ss:$0 sm:$0xff] }
   0xb   :  { %32 = vadd.xlane.f32.xlu0 %v31_v3  ;;  %192 = vmatpush.msra.mxu2 %v135_v33 }
   0xc   :  { %v40_v8 = vmul.f32 %v203_v5, %v39_v7  ;;  %161 = vmatpush.msra.mxu1 %v135_v33 }
   0xd   :  { %193 = vmatpush.msra.mxu2 %v134_v36 }
   0xe   :  { %v41_v9 = vadd.f32 %v203_v5, %v40_v8  ;;  %162 = vmatpush.msra.mxu1 %v134_v36 }
   0xf   :  { %194 = vmatpush.msra.mxu2 %v133_v58 }
  0x10   :  { %v43_v10 = vsel %vm42_vm1, %v203_v5, %v41_v9  ;;  %163 = vmatpush.msra.mxu1 %v133_v58 }
  0x11   :  { %195 = vmatpush.msra.mxu2 %v132_v59 }
  0x12   :  { %164 = vmatpush.msra.mxu1 %v132_v59 }
  0x13   :  { %196 = vmatpush.msra.mxu2 %v131_v60 }
  0x14   :  { %165 = vmatpush.msra.mxu1 %v131_v60 }
  0x76   :  { %v36_v11 = vpop.xlane.xlu0 %35 }
  0x77   :  { %v45_v12 = vmul.f32 %v43_v10, %v36_v11 }
  0x79   :  { %v264_v13 = vsub.f32 %v252_v0, %v45_v12 }
  0x7b   :  { %v49_v14 = vmul.f32 %v264_v13, %v264_v13 }
  0x7d   :  { %v53_v15 = vsel %vm30_vm0, %v49_v14, 0.0 }
  0x7e   :  { %54 = vadd.xlane.f32.xlu1 %v53_v15  ;;  %v33_v16 = vpop.xlane.xlu0 %32 }
  0x7f   :  { %v44_v17 = vmul.f32 %v43_v10, %v33_v16 }
  0x81   :  { %v270_v18 = vsub.f32 %v259_v2, %v44_v17 }
  0x83   :  { %v48_v19 = vmul.f32 %v270_v18, %v270_v18 }
  0x85   :  { %v50_v20 = vsel %vm30_vm0, %v48_v19, 0.0 }
  0x86   :  { %51 = vadd.xlane.f32.xlu1 %v50_v20 }
  0xf1   :  { %v55_v25 = vpop.xlane.xlu1 %54 }
  0xf2   :  { %v57_v26 = vmul.f32 %v55_v25, %v43_v10 }
  0xf4   :  { %v59_v27 = vadd.f32 1e-05, %v57_v26 }
  0xf6   :  { %204 = vrsqrt.f32 %v59_v27  ;;  %vm76_vm3 = vweird.f32 %v59_v27 }
  0xf9   :  { %v52_v31 = vpop.xlane.xlu1 %51 }
  0xfa   :  { %v56_v32 = vmul.f32 %v52_v31, %v43_v10 }
  0xfc   :  { %v205_v34 = vpop.eup %204  ;;  %v58_v35 = vadd.f32 1e-05, %v56_v32 }
  0xfd   :  { %v71_v37 = vmul.f32 %v205_v34, %v59_v27  ;;  %vm77_vm2 = vweird.f32 %v205_v34 }
  0xfe   :  { %206 = vrsqrt.f32 %v58_v35  ;;  %vm78_vm4 = vmor %vm76_vm3, %vm77_vm2  ;;  %vm66_vm6 = vweird.f32 %v58_v35 }
  0xff   :  { %v72_v38 = vmul.f32 %v205_v34, %v71_v37 }
 0x101   :  { %v73_v39 = vmul.f32 0.5, %v72_v38 }
 0x103   :  { %v74_v40 = vsub.f32 1.5, %v73_v39 }
 0x104   :  { %v207_v41 = vpop.eup %206 }
 0x105   :  { %v75_v42 = vmul.f32 %v205_v34, %v74_v40  ;;  %v61_v43 = vmul.f32 %v207_v41, %v58_v35  ;;  %vm67_vm5 = vweird.f32 %v207_v41 }
 0x106   :  { %vm68_vm7 = vmor %vm66_vm6, %vm67_vm5 }
 0x107   :  { %v79_v45 = vsel %vm78_vm4, %v205_v34, %v75_v42  ;;  %v62_v46 = vmul.f32 %v207_v41, %v61_v43 }
 0x108   :  { %v81_v47 = vmul.f32 %v79_v45, %v264_v13 }
 0x109   :  { %v63_v49 = vmul.f32 0.5, %v62_v46 }
 0x10a   :  { %v86_v50 = vmul.f32 %v198_v44, %v81_v47 }
 0x10b   :  { %v64_v51 = vsub.f32 1.5, %v63_v49 }
 0x10c   :  { %v91_v52 = vadd.f32 %v199_v48, %v86_v50 }
 0x10d   :  { %v65_v53 = vmul.f32 %v207_v41, %v64_v51 }
 0x10e   :  { %182 = vmatmul.msk.f32.vlgmr.msra.gmra.mxu3 %vm30_vm0, %v91_v52 }
 0x10f   :  { %v69_v54 = vsel %vm68_vm7, %v207_v41, %v65_v53 }
 0x110   :  { %v80_v55 = vmul.f32 %v69_v54, %v270_v18 }
 0x112   :  { %v85_v56 = vmul.f32 %v198_v44, %v80_v55 }
 0x114   :  { %v90_v57 = vadd.f32 %v199_v48, %v85_v56 }
 0x116   :  { %181 = vmatmul.msk.f32.vlgmr.msra.gmra.mxu0 %vm30_vm0, %v90_v57 }
 0x191   :  { %v126_v62 = vpop.f32.mrf.mxu3 }
 0x192   :  { %v127_v63 = vadd.f32 %v200_v61, %v126_v62 }
 0x193   :  { %v123_v1 = vpop.f32.mrf.mxu0 }
 0x194   :  { %v130_v3 = vmax.f32 %v127_v63, 0.0  ;;  %v124_v4 = vadd.f32 %v200_v61, %v123_v1 }
 0x196   :  { %v129_v5 = vmax.f32 %v124_v4, 0.0  ;;  %184 = vmatmul.msk.f32.vlgmr.msra.gmra.mxu2 %vm143_vm8, %v130_v3 }
 0x198   :  { %183 = vmatmul.msk.f32.vlgmr.msra.gmra.mxu1 %vm143_vm8, %v129_v5 }
 0x215   :  { %v167_v7 = vpop.f32.mrf.mxu1 }
 0x216   :  { %v168_v8 = vadd.f32 %v201_v6, %v167_v7 }
 0x218   :  { %v173_v9 = vadd.f32 %v168_v8, %v259_v2 }
 0x219   :  { %v170_v10 = vpop.f32.mrf.mxu2 }
 0x21a   :  { %175 = vst.msk [vmem:[%s344_s7] sm:$0xff] %vm30_vm0, %v173_v9  ;;  %v171_v11 = vadd.f32 %v201_v6, %v170_v10 }
 0x21c   :  { %v174_v12 = vadd.f32 %v171_v11, %v252_v0 }
 0x21e   :  { %176 = vst.msk [vmem:[%s344_s7 + $0x8] sm:$0xff] %vm30_vm0, %v174_v12 }

// kernel: transformer_decoder_layer.4
= control target key start
LH: loop header
LB: loop body
LE: loop exit
PB: predicated region body
PF: predicated region fallthrough
CT: control target
= control target key end

     0   :  { %s1648_s0 = inlined_call_operand.vmem [shape: f32[2,8,32], index: 0, kind: input, shape index: {}]   ;;  %s1649_s1 = inlined_call_operand.vmem [shape: f32[2,12,48], index: 1, kind: input, shape index: {}]   ;;  %s1650_s2 = inlined_call_operand.vmem [shape: f32[1,32], index: 2, kind: input, shape index: {}]   ;;  %s1651_s3 = inlined_call_operand.vmem [shape: f32[1,32], index: 3, kind: input, shape index: {}]   ;;  %s1652_s4 = inlined_call_operand.vmem [shape: f32[32,32], index: 4, kind: input, shape index: {}]   ;;  %s1653_s5 = inlined_call_operand.vmem [shape: f32[1,32], index: 5, kind: input, shape index: {}]   ;;  %s1654_s6 = inlined_call_operand.vmem [shape: f32[48,32], index: 6, kind: input, shape index: {}]   ;;  %s1655_s7 = inlined_call_operand.vmem [shape: f32[1,32], index: 7, kind: input, shape index: {}]   ;;  %s1656_s8 = inlined_call_operand.vmem [shape: f32[48,32], index: 8, kind: input, shape index: {}]   ;;  %s1657_s9 = inlined_call_operand.vmem [shape: f32[1,32], index: 9, kind: input, shape index: {}]   ;;  %s1658_s10 = inlined_call_operand.vmem [shape: f32[32,32], index: 10, kind: input, shape index: {}]   ;;  %s1659_s11 = inlined_call_operand.vmem [shape: f32[1,32], index: 11, kind: input, shape index: {}]   ;;  %s1660_s12 = inlined_call_operand.vmem [shape: f32[2,8,32], index: 12, kind: output, shape index: {0}]   ;;  %s1661_s13 = inlined_call_operand.hbm [shape: f32[2,8,12], index: 13, kind: output, shape index: {1}]  }
   0x1   :  { %1670 = sst [smem:[#allocation7_spill]] %s1648_s0 }
   0x2   :  { %1671 = sst [smem:[#allocation8_spill]] %s1649_s1 }
   0x3   :  { %1672 = sst [smem:[#allocation9_spill]] %s1650_s2 }
   0x4   :  { %1673 = sst [smem:[#allocation10_spill]] %s1651_s3 }
   0x5   :  { %1674 = sst [smem:[#allocation11_spill]] %s1652_s4 }
   0x6   :  { %1675 = sst [smem:[#allocation12_spill]] %s1653_s5 }
   0x7   :  { %19 = vsyncpa [#allocation3], 0 }
   0x8   :  { %21 = vsyncpa [#allocation3 + $0x1], 0  ;;  %s1383_s25 = smov 0   ;;  %s1385_s26 = smov 0  }
   0x9   :  { %s1387_s27 = smov 0   ;;  %s1389_s28 = smov 0  }
   0xa LB: > { %1676 = sst [smem:[#allocation5_spill]] %s1303_s27  ;;  %s1404_s29 = sadd.s32 4294967295, %s1307_s28   ;;  %s1307_s28 = sphi %s1389_s28, %s1694_s28   ;;  %s1303_s27 = sphi %s1387_s27, %s1691_s27   ;;  %s1299_s26 = sphi %s1385_s26, %s1693_s26   ;;  %s1295_s25 = sphi %s1383_s25, %s1692_s25  }
   0xb   : > { %s1133_s30 = sadd.s32 4294967294, %s1307_s28   ;;  %s1408_s14 = sadd.s32 1, %s1307_s28  }
   0xc   : > { %s322_s15 = sadd.s32 1, %s1303_s27  ;;  %s319_s16 = ssub.s32 %s1307_s28, %s1408_s14 }
   0xd   : > { %p332_p0 = scmp.ne.s32.totalorder %s1303_s27, %s1299_s26  ;;  %p320_p1 = scmp.eq.s32.totalorder %s319_s16, 0 }
   0xe   : > { %p333_p2 = scmp.eq.s32.totalorder %s1404_s29, 1  ;;  %p338_p3 = scmp.ne.s32.totalorder %s1299_s26, %s1295_s25 }
   0xf   : > { %p339_p4 = scmp.eq.s32.totalorder %s1133_s30, 1  ;;  %p1136_p7 = scmp.ge.s32.totalorder %s1307_s28, 1 }
  0x10   : > { %s1419_s17 = scalar_select %p320_p1, %s1303_s27, %s322_s15  }
  0x11   : > { %p1421_p5 = por %p333_p2, %p332_p0  ;;  %p1425_p6 = por %p339_p4, %p338_p3 }
  0x12   : > { %1677 = sst [smem:[#allocation6_spill]] %s1419_s17  ;;  %p402_p8 = scmp.lt.s32.totalorder %s1307_s28, 3 }
  0x14   : > { %p403_p9 = pnand %p1136_p7, %p402_p8 }
  0x15   : > { %p454_p10 = scmp.lt.s32.totalorder (!%p403_p9), %s1404_s29, 1  ;;  %s1680_s0 = sld [smem:[#allocation7_spill]] (!%p403_p9) }
  0x16   : > { %406 = sbr.rel (%p403_p9) target bundleno = 1600 (0x640), region = 68  ;;  %s1681_s1 = sld [smem:[#allocation8_spill]] (!%p403_p9) }
  0x17   : > { %s1682_s4 = sld [smem:[#allocation11_spill]] (!%p403_p9)  ;;  %s1668_s15 = smov (!%p403_p9), 112  }
  0x18   : > { %s1683_s2 = sld [smem:[#allocation9_spill]] (!%p403_p9)  ;;  %s1664_s27 = smov (!%p403_p9), 104  }
  0x19   : > { %s1684_s3 = sld [smem:[#allocation10_spill]] (!%p403_p9)  ;;  %s1687_s30 = smov (!%p403_p9), 120  }
  0x1a   : > { %s1685_s5 = sld [smem:[#allocation12_spill]] (!%p403_p9)  ;;  %s1688_s17 = smov (!%p403_p9), 104  }
  0x1b   : > { %s1433_s20 = scalar_select %p454_p10, %s1404_s29, 1  ;;  %vm472_vm0 = vcmask 261120   ;;  %v1309_v2 = vmov 32.0   ;;  %v547_v3 = vld [vmem:[%s1654_s6 + $0x28] sm:$0xff]  ;;  %v546_v4 = vld [vmem:[%s1654_s6 + $0x20] sm:$0xff]  ;;  %v545_v5 = vld [vmem:[%s1654_s6 + $0x18] sm:$0xff] }
  0x1c   : > { %1225 = vrcp.f32 %v1309_v2  ;;  %569 = vmatpush.msra.mxu1 %v547_v3  ;;  %v544_v7 = vld [vmem:[%s1654_s6 + $0x10] sm:$0xff]  ;;  %v543_v9 = vld [vmem:[%s1654_s6 + $0x8] sm:$0xff]  ;;  %v542_v10 = vld [vmem:[%s1654_s6] sm:$0xff]  ;;  %vm552_vm1 = vcmask 392192   ;;  %vm620_vm3 = vcmask 64512   ;;  %vm650_vm7 = vcmask 97280  }
  0x1d   : > { %s1663_s21 = sshll.u32 %s1433_s20, 3  ;;  %s1175_s23 = sshll.u32 %s1433_s20, 4  ;;  %v513_v22 = vld [vmem:[%s1682_s4 + $0x18] sm:$0xff]  ;;  %v512_v23 = vld [vmem:[%s1682_s4 + $0x10] sm:$0xff]  ;;  %v511_v24 = vld [vmem:[%s1682_s4 + $0x8] sm:$0xff]  ;;  %vm666_vm8 = vcmask 1043456  }
  0x1e   : > { %s457_s24 = scalar_lea.vmem %s1680_s0, %s1663_s21  ;;  %570 = vmatpush.msra.mxu1 %v546_v4  ;;  %s462_s0 = scalar_lea.vmem %s1681_s1, %s1175_s23  ;;  %533 = vmatpush.msra.mxu0 %v513_v22  ;;  %v510_v25 = vld [vmem:[%s1682_s4] sm:$0xff]  ;;  %v587_v56 = vld [vmem:[%s1656_s8 + $0x28] sm:$0xff]  ;;  %v585_v58 = vld [vmem:[%s1656_s8 + $0x18] sm:$0xff] }
  0x1f   : > { %v1441_v0 = vld [vmem:[%s457_s24] sm:$0xff]  ;;  %v1471_v14 = vld [vmem:[%s462_s0 + $0x8] sm:$0xf]  ;;  %s1666_s21 = smov 120   ;;  %602 = vmatpush.msra.mxu2 %v587_v56  ;;  %v584_v59 = vld [vmem:[%s1656_s8 + $0x10] sm:$0xff]  ;;  %s451_s23 = sand.u32 1, %s1299_s26  }
  0x20   : > { %v473_v1 = vsel %vm472_vm0, %v1441_v0, 0.0  ;;  %571 = vmatpush.msra.mxu1 %v545_v5  ;;  %v1467_v11 = vld [vmem:[%s462_s0] sm:$0xff]  ;;  %534 = vmatpush.msra.mxu0 %v512_v23  ;;  %v583_v60 = vld [vmem:[%s1656_s8 + $0x8] sm:$0xff]  ;;  %s1137_s0 = sshll.u32 %s451_s23, 3  ;;  %s1020_s1 = scalar_lea.sflag [#allocation3], %s451_s23 }
  0x21   : > { %474 = vadd.xlane.f32.xlu0 %v473_v1  ;;  %v1221_v29 = vld [vmem:[%s1655_s7] ss:$0 sm:$0xff]  ;;  %s453_s24 = scalar_lea.vmem [#allocation2], %s1137_s0 }
  0x22   : > { %v1226_v6 = vpop.eup %1225  ;;  %572 = vmatpush.msra.mxu1 %v544_v7  ;;  %535 = vmatpush.msra.mxu0 %v511_v24  ;;  %v1219_v40 = vld [vmem:[%s1683_s2] ss:$0 sm:$0xff] }
  0x23   : > { %v477_v8 = vmul.f32 32.0, %v1226_v6  ;;  %vm481_vm2 = vweird.f32 %v1226_v6  ;;  %v1220_v43 = vld [vmem:[%s1684_s3] ss:$0 sm:$0xff] }
  0x24   : > { %573 = vmatpush.msra.mxu1 %v543_v9  ;;  %536 = vmatpush.msra.mxu0 %v510_v25  ;;  %v1222_v47 = vld [vmem:[%s1685_s5] ss:$0 sm:$0xff] }
  0x25   : > { %v478_v12 = vsub.f32 1.0, %v477_v8  ;;  %v615_v52 = vld [vmem:[%s1658_s10] sm:$0xff] }
  0x26   : > { %574 = vmatpush.msra.mxu1 %v542_v10  ;;  %v586_v57 = vld [vmem:[%s1656_s8 + $0x20] sm:$0xff] }
  0x27   : > { %1143 = vmatmul.msk.f32.vlgmr.msra.gmra.mxu1 %vm552_vm1, %v1467_v11  ;;  %v479_v13 = vmul.f32 %v1226_v6, %v478_v12  ;;  %603 = vmatpush.msra.mxu2 %v586_v57  ;;  %v582_v61 = vld [vmem:[%s1656_s8] sm:$0xff] }
  0x28   : > { %806 = vmatpush.msrb.mxu1 %v615_v52  ;;  %v1223_v9 = vld [vmem:[%s1657_s9] ss:$0 sm:$0xff] }
  0x29   : > { %v480_v15 = vadd.f32 %v1226_v6, %v479_v13  ;;  %604 = vmatpush.msra.mxu2 %v585_v58 }
  0x2b   : > { %v482_v16 = vsel %vm481_vm2, %v1226_v6, %v480_v15  ;;  %605 = vmatpush.msra.mxu2 %v584_v59 }
  0x2d   : > { %606 = vmatpush.msra.mxu2 %v583_v60 }
  0x2f   : > { %1144 = vmatmul.msk.f32.gmra.mxu1 %vm552_vm1, %v1471_v14  ;;  %607 = vmatpush.msra.mxu2 %v582_v61 }
  0x30   : > { %1145 = vmatmul.msk.f32.vlgmr.msra.gmra.mxu2 %vm552_vm1, %v1467_v11 }
  0x38   : > { %1146 = vmatmul.msk.f32.gmra.mxu2 %vm552_vm1, %v1471_v14 }
  0x94   : > { %v475_v17 = vpop.xlane.xlu0 %474 }
  0x95   : > { %v483_v18 = vmul.f32 %v482_v16, %v475_v17 }
  0x97   : > { %v484_v19 = vsub.f32 %v1441_v0, %v483_v18 }
  0x99   : > { %v485_v20 = vmul.f32 %v484_v19, %v484_v19 }
  0x9b   : > { %v486_v21 = vsel %vm472_vm0, %v485_v20, 0.0 }
  0x9c   : > { %487 = vadd.xlane.f32.xlu0 %v486_v21 }
  0xa4   : > { %v576_v26 = vpop.f32.mrf.mxu1 }
  0xa5   : > { %v577_v33 = vadd.f32 %v1221_v29, %v576_v26 }
  0xac   : > { %v579_v31 = vpop.f32.mrf.mxu1 }
  0xad   : > { %v1492_v32 = vadd.f32 %v1221_v29, %v579_v31 }
  0xaf   : > { %694 = vrot.lane.b32.xlu2 %v1492_v32, %s1666_s21  ;;  %1147 = vmatpush.xpose.msk.msra.mxu3 %vm620_vm3, %v1492_v32 }
  0xb3   : > { %1148 = vmatpush.xpose.msk.msra.mxu3 %vm620_vm3, %v577_v33  ;;  %v609_v8 = vpop.f32.mrf.mxu2 }
  0xb4   : > { %v610_v11 = vadd.f32 %v1223_v9, %v609_v8 }
  0xb7   : > { %692 = vrot.lane.b32.xlu2 %v577_v33, %s1666_s21 }
  0xbb   : > { %v612_v10 = vpop.f32.mrf.mxu2 }
  0xbc   : > { %v1555_v12 = vadd.f32 %v1223_v9, %v612_v10 }
  0xbe   : > { %1150 = vmatpush.msk.msrb.mxu0 %vm666_vm8, %v1555_v12 }
  0xbf   : > { %813 = vrot.lane.b32.xlu2 %v577_v33, %s1668_s15 }
  0xc0   : > { %685 = vmatpush.msrb.mxu0 %v610_v11 }
 0x109   : > { %v695_v46 = vpop.permute.xlu2 %694 }
 0x10a   : > { %1152 = vmatpush.xpose.msk.msrb.mxu3 %vm620_vm3, %v695_v46 }
 0x10f   : > { %v488_v27 = vpop.xlane.xlu0 %487 }
 0x110   : > { %v489_v28 = vmul.f32 %v488_v27, %v482_v16 }
 0x111   : > { %v693_v48 = vpop.permute.xlu2 %692 }
 0x112   : > { %v490_v30 = vadd.f32 1e-05, %v489_v28  ;;  %1153 = vmatpush.xpose.msk.msrb.mxu3 %vm620_vm3, %v693_v48 }
 0x114   : > { %1227 = vrsqrt.f32 %v490_v30  ;;  %vm497_vm5 = vweird.f32 %v490_v30 }
 0x119   : > { %v814_v53 = vpop.permute.xlu2 %813 }
 0x11a   : > { %v1228_v34 = vpop.eup %1227 }
 0x11b   : > { %v492_v35 = vmul.f32 %v1228_v34, %v490_v30  ;;  %vm498_vm4 = vweird.f32 %v1228_v34 }
 0x11c   : > { %vm499_vm6 = vmor %vm497_vm5, %vm498_vm4 }
 0x11d   : > { %v493_v36 = vmul.f32 %v1228_v34, %v492_v35 }
 0x11f   : > { %v494_v37 = vmul.f32 0.5, %v493_v36 }
 0x121   : > { %v495_v38 = vsub.f32 1.5, %v494_v37 }
 0x123   : > { %v496_v39 = vmul.f32 %v1228_v34, %v495_v38 }
 0x125   : > { %v500_v41 = vsel %vm499_vm6, %v1228_v34, %v496_v39 }
 0x126   : > { %v501_v42 = vmul.f32 %v500_v41, %v484_v19 }
 0x128   : > { %v505_v44 = vmul.f32 %v1219_v40, %v501_v42 }
 0x12a   : > { %v509_v45 = vadd.f32 %v1220_v43, %v505_v44 }
 0x12c   : > { %1142 = vmatmul.msk.f32.vlgmr.msra.gmra.mxu0 %vm472_vm0, %v509_v45 }
 0x1a9   : > { %v538_v49 = vpop.f32.mrf.mxu0 }
 0x1aa   : > { %v539_v50 = vadd.f32 %v1222_v47, %v538_v49  ;;  %v616_v47 = vld [vmem:[%s1658_s10 + $0x8] sm:$0xff] }
 0x1ac   : > { %v541_v51 = vmul.f32 0.35355338, %v539_v50 }
 0x1ae   : > { %811 = vrot.lane.b32.xlu2 %v541_v51, %s1668_s15  ;;  %690 = vrot.lane.b32.xlu0 %v541_v51, %s1666_s21  ;;  %s1686_s21 = smov 112  }
 0x1af   : > { %1149 = vmatmul.msk.f32.vlgmr.msra.gmra.mxu3 %vm620_vm3, %v541_v51 }
 0x1b0   : > { %783 = vmatpush.msra.mxu3 %v616_v47 }
 0x1b6   : > { %913 = vrot.lane.b32.xlu2 %v1492_v32, %s1664_s27  ;;  %911 = vrot.lane.b32.xlu0 %v577_v33, %s1664_s27 }
 0x1be   : > { %909 = vrot.lane.b32.xlu2 %v541_v51, %s1664_s27 }
 0x208   : > { %v812_v54 = vpop.permute.xlu2 %811 }
 0x210   : > { %v914_v55 = vpop.permute.xlu2 %913 }
 0x211   : > { %1165 = vmatpush.xpose.msk.msra.mxu1 %vm620_vm3, %v914_v55 }
 0x218   : > { %v910_v25 = vpop.permute.xlu2 %909 }
 0x220   : > { %v691_v62 = vpop.permute.xlu0 %690 }
 0x221   : > { %1154 = vmatmul.msk.f32.vlgmr.msrb.gmra.mxu3 %vm620_vm3, %v691_v62  ;;  %v617_v62 = vld [vmem:[%s1658_s10 + $0x10] sm:$0xff] }
 0x222   : > { %903 = vmatpush.msrb.mxu3 %v617_v62 }
 0x228   : > { %v912_v63 = vpop.permute.xlu0 %911 }
 0x229   : > { %1166 = vmatpush.xpose.msk.msra.mxu1 %vm620_vm3, %v912_v63  ;;  %v618_v63 = vld [vmem:[%s1658_s10 + $0x18] sm:$0xff] }
 0x232   : > { %v647_v1 = vpop.f32.mrf.mxu3 }
 0x233   : > { %v651_v2 = vsel %vm650_vm7, %v647_v1, -inf }
 0x234   : > { %652 = vmax.xlane.f32.xlu1 %v651_v2 }
 0x2a4   : > { %v719_v13 = vpop.f32.mrf.mxu3 }
 0x2a5   : > { %v722_v14 = vsel %vm650_vm7, %v719_v13, -inf }
 0x2a7   : > { %v653_v3 = vpop.xlane.xlu1 %652 }
 0x2a8   : > { %v654_v4 = vsub.f32 %v647_v1, %v653_v3 }
 0x2aa   : > { %v655_v5 = vmul.f32 1.442695, %v654_v4 }
 0x2ac   : > { %1229 = vpow2.f32 %v655_v5 }
 0x2b2   : > { %v1230_v6 = vpop.eup %1229 }
 0x2b3   : > { %v657_v7 = vsel %vm650_vm7, %v1230_v6, 0.0 }
 0x2b4   : > { %658 = vadd.xlane.f32.xlu1 %v657_v7 }
 0x2cd   : > { %815 = vrot.lane.b32.xlu1 %v1492_v32, %s1686_s21 }
 0x2f7   : > { %723 = vmax.xlane.f32.xlu1 %v722_v14 }
 0x327   : > { %v659_v15 = vpop.xlane.xlu1 %658 }
 0x328   : > { %1231 = vrcp.f32 %v659_v15 }
 0x32e   : > { %v1232_v16 = vpop.eup %1231 }
 0x32f   : > { %v1560_v17 = vmul.f32 %v1232_v16, %v1230_v6 }
 0x331   : > { %1151 = vmatmul.msk.f32.vlgmr.msrb.gmra.mxu0 %vm650_vm7, %v1560_v17 }
 0x33f   : > { %v816_v18 = vpop.permute.xlu1 %815 }
 0x340   : > { %1159 = vmatpush.xpose.msk.msrb.mxu2 %vm620_vm3, %v816_v18 }
 0x344   : > { %1160 = vmatpush.xpose.msk.msrb.mxu2 %vm620_vm3, %v814_v53 }
 0x347   : > { %1161 = vmatmul.msk.f32.vlgmr.msrb.gmra.mxu2 %vm620_vm3, %v812_v54 }
 0x36a   : > { %v724_v19 = vpop.xlane.xlu1 %723 }
 0x36b   : > { %v725_v20 = vsub.f32 %v719_v13, %v724_v19 }
 0x36d   : > { %v726_v21 = vmul.f32 1.442695, %v725_v20 }
 0x36f   : > { %1233 = vpow2.f32 %v726_v21 }
 0x375   : > { %v1234_v22 = vpop.eup %1233 }
 0x376   : > { %v728_v23 = vsel %vm650_vm7, %v1234_v22, 0.0 }
 0x377   : > { %729 = vadd.xlane.f32.xlu1 %v728_v23 }
 0x390   : > { %735 = vrot.lane.b32.xlu1 %v610_v11, %s1687_s30 }
 0x398   : > { %953 = vrot.lane.b32.xlu1 %v610_v11, %s1688_s17 }
 0x3ae   : > { %v687_v24 = vpop.f32.mrf.mxu0 }
 0x3af   : > { %1158 = vmatmul.msk.f32.vlgmr.msrb.gmra.mxu1 %vm620_vm3, %v687_v24 }
 0x3b7   : > { %1167 = vmatmul.msk.f32.vlgmr.msra.gmra.mxu1 %vm620_vm3, %v910_v25 }
 0x3ca   : > { %v840_v26 = vpop.f32.mrf.mxu2 }
 0x3cb   : > { %v843_v27 = vsel %vm650_vm7, %v840_v26, -inf }
 0x3cc   : > { %844 = vmax.xlane.f32.xlu0 %v843_v27 }
 0x3e0   : > { %737 = vrot.lane.b32.xlu0 %v1555_v12, %s1687_s30 }
 0x3e8   : > { %855 = vrot.lane.b32.xlu0 %v610_v11, %s1686_s21 }
 0x3ea   : > { %v730_v34 = vpop.xlane.xlu1 %729 }
 0x3f0   : > { %955 = vrot.lane.b32.xlu0 %v1555_v12, %s1688_s17  ;;  %s1172_s17 = sshll.u32 %s1404_s29, 3  ;;  %s1265_s29 = scalar_lea.hbm %s1661_s13, 16 }
 0x3f1   : > { %s1033_s0 = scalar_lea.hbm %s1661_s13, %s1172_s17 }
 0x3f2   : > { %s1037_s15 = sshll.u32 %s1033_s0, 4  ;;  %s1038_s15 = int_to_ptr.hbm [resolvable:$true] %s1037_s15 }
 0x3f3   : > { %s1259_s27 = sshra.s32 %s1038_s15, 4  ;;  %s1260_s27 = int_to_ptr.hbm [resolvable:$true] %s1259_s27 }
 0x3f4   : > { %s1261_s30 = scalar_lea.hbm %s1260_s27, 8  ;;  %p1266_p0 = scmp.lt.s32.totalorder %s1260_s27, %s1661_s13 }
 0x3f5   : > { %p1262_p11 = scmp.ne.s32.totalorder %s1260_s27, %s1261_s30  ;;  %p1267_p1 = scmp.lt.s32.totalorder %s1265_s29, %s1261_s30 }
 0x3f7   : > { %p1263_p12 = pnand %p1262_p11, %p1421_p5  ;;  %p1268_p2 = por %p1267_p1, %p1266_p0 }
 0x3f9   : > { %p1264_p13 = pneg %p1263_p12 }
 0x3fb   : > { %p1269_p3 = pnand %p1268_p2, %p1264_p13 }
 0x402   : > { %v736_v40 = vpop.permute.xlu1 %735 }
 0x40a   : > { %v954_v43 = vpop.permute.xlu1 %953 }
 0x42c   : > { %v1578_v28 = vpop.f32.mrf.mxu1 }
 0x434   : > { %v938_v29 = vpop.f32.mrf.mxu1 }
 0x435   : > { %v941_v30 = vsel %vm650_vm7, %v938_v29, -inf }
 0x436   : > { %942 = vmax.xlane.f32.xlu2 %v941_v30 }
 0x43f   : > { %v845_v31 = vpop.xlane.xlu0 %844 }
 0x440   : > { %v846_v32 = vsub.f32 %v840_v26, %v845_v31 }
 0x442   : > { %v847_v33 = vmul.f32 1.442695, %v846_v32 }
 0x444   : > { %1235 = vpow2.f32 %v847_v33 }
 0x445   : > { %1237 = vrcp.f32 %v730_v34 }
 0x44a   : > { %v1236_v35 = vpop.eup %1235 }
 0x44b   : > { %v849_v36 = vsel %vm650_vm7, %v1236_v35, 0.0  ;;  %v1238_v37 = vpop.eup %1237 }
 0x44c   : > { %850 = vadd.xlane.f32.xlu2 %v849_v36  ;;  %v732_v39 = vmul.f32 %v1238_v37, %v1234_v22 }
 0x44e   : > { %v733_v55 = vadd.f32 %v732_v39, %v1560_v17 }
 0x452   : > { %v738_v38 = vpop.permute.xlu0 %737 }
 0x453   : > { %1155 = vmatpush.msk.msra.mxu0 %vm666_vm8, %v738_v38 }
 0x455   : > { %760 = vmatpush.msra.mxu0 %v736_v40 }
 0x456   : > { %1156 = vmatmul.msk.f32.vlgmr.msra.gmra.mxu0 %vm650_vm7, %v732_v39 }
 0x45a   : > { %v856_v41 = vpop.permute.xlu0 %855 }
 0x462   : > { %v956_v42 = vpop.permute.xlu0 %955 }
 0x463   : > { %1168 = vmatpush.msk.msra.mxu2 %vm666_vm8, %v956_v42 }
 0x465   : > { %978 = vmatpush.msra.mxu2 %v954_v43 }
 0x4a9   : > { %v943_v44 = vpop.xlane.xlu2 %942 }
 0x4aa   : > { %v944_v45 = vsub.f32 %v938_v29, %v943_v44 }
 0x4ac   : > { %v945_v46 = vmul.f32 1.442695, %v944_v45 }
 0x4ae   : > { %1239 = vpow2.f32 %v945_v46 }
 0x4b4   : > { %v1240_v48 = vpop.eup %1239 }
 0x4b5   : > { %v947_v49 = vsel %vm650_vm7, %v1240_v48, 0.0 }
 0x4b6   : > { %948 = vadd.xlane.f32.xlu2 %v947_v49 }
 0x4bf   : > { %v851_v51 = vpop.xlane.xlu2 %850 }
 0x4c0   : > { %1241 = vrcp.f32 %v851_v51 }
 0x4c6   : > { %v1242_v53 = vpop.eup %1241 }
 0x4c7   : > { %v853_v54 = vmul.f32 %v1242_v53, %v1236_v35 }
 0x4c9   : > { %v854_v57 = vadd.f32 %v853_v54, %v733_v55 }
 0x4ce   : > { %857 = vrot.lane.b32.xlu2 %v1555_v12, %s1686_s21  ;;  %s1035_s21 = sshll.u32 %s453_s24, 4  ;;  %s1036_s21 = int_to_ptr.vmem [resolvable:$true] %s1035_s21 }
 0x4d3   : > { %v762_v50 = vpop.f32.mrf.mxu0 }
 0x4d4   : > { %1157 = vmatmul.msk.f32.vlgmr.msra.gmra.mxu3 %vm620_vm3, %v762_v50 }
 0x529   : > { %v949_v52 = vpop.xlane.xlu2 %948 }
 0x52a   : > { %1243 = vrcp.f32 %v949_v52 }
 0x530   : > { %v1244_v56 = vpop.eup %1243 }
 0x531   : > { %v951_v58 = vmul.f32 %v1244_v56, %v1240_v48  ;;  %v858_v59 = vpop.permute.xlu2 %857 }
 0x532   : > { %1162 = vmatpush.msk.msrb.mxu0 %vm666_vm8, %v858_v59 }
 0x533   : > { %1169 = vmatmul.msk.f32.vlgmr.msra.gmra.mxu2 %vm650_vm7, %v951_v58  ;;  %v952_v60 = vadd.f32 %v951_v58, %v854_v57 }
 0x534   : > { %880 = vmatpush.msrb.mxu0 %v856_v41 }
 0x535   : > { %1163 = vmatmul.msk.f32.vlgmr.msrb.gmra.mxu0 %vm650_vm7, %v853_v54  ;;  %v1013_v61 = vmul.f32 0.25, %v952_v60 }
 0x536   : > { %1001 = vmatpush.msra.mxu0 %v618_v63 }
 0x537   : > { %1014 = vst.msk [vmem:[%s453_s24] sm:$0xff] %vm650_vm7, %v1013_v61 }
 0x5b2   : > { %v882_v1 = vpop.f32.mrf.mxu0 }
 0x5b3   : > { %1164 = vmatmul.msk.f32.vlgmr.msrb.gmra.mxu3 %vm620_vm3, %v882_v1 }
 0x5b6   : > { %v980_v2 = vpop.f32.mrf.mxu2 }
 0x5b7   : > { %1170 = vmatmul.msk.f32.vlgmr.msra.gmra.mxu0 %vm620_vm3, %v980_v2 }
 0x5b8   : > { %1272 = shalt.err (!%p1269_p3)
}
 0x5b9   : > { %1176 = dma.vmem_to_hbm [thread:$0]  (%p1421_p5), %s1036_s21, 128, %s1038_s15, %s1020_s1   ;;  %v785_v3 = vpop.f32.mrf.mxu3  ;;  %v1224_v7 = vld [vmem:[%s1659_s11] ss:$0 sm:$0xff] }
 0x5ba   : > { %v809_v4 = vadd.f32 %v1578_v28, %v785_v3  ;;  %s1689_s3 = sshll.u32 %s1433_s20, 3 }
 0x5bb   : > { %s466_s24 = scalar_lea.vmem %s1660_s12, %s1689_s3 }
 0x634   : > { %v1003_v8 = vpop.f32.mrf.mxu0 }
 0x636   : > { %v905_v5 = vpop.f32.mrf.mxu3 }
 0x637   : > { %v908_v6 = vadd.f32 %v905_v5, %v809_v4 }
 0x639   : > { %v1006_v9 = vadd.f32 %v1003_v8, %v908_v6 }
 0x63b   : > { %v1010_v10 = vadd.f32 %v1224_v7, %v1006_v9 }
 0x63d   : > { %v1011_v11 = vadd.f32 %v1010_v10, %v1441_v0 }
 0x63f   : > { %1012 = vst.msk [vmem:[%s466_s24] sm:$0xff] %vm472_vm0, %v1011_v11 }
 0x640 PF: > { %p1182_p4 = scmp.ge.s32.totalorder %s1307_s28, 2  ;;  %s1056_s1 = sand.u32 1, %s1295_s25  }
 0x641   : > { %s1057_s18 = scalar_lea.sflag [#allocation3], %s1056_s1 }
 0x642   : > { %p1179_p5 = pnand %p1182_p4, %p1425_p6 }
 0x644   : > { %p1180_p7 = pneg %p1179_p5 }
 0x646   : > { %1290 = dma.done.wait (%p1180_p7), %s1057_s18, 128  }
 0x647   : > { %1292 = vsyncadd (%p1180_p7), %s1057_s18, 4294967168  ;;  %s1690_s20 = sld [smem:[#allocation5_spill]]  ;;  %p24_p8 = scmp.ge.s32.totalorder %s1408_s14, 4  }
 0x648   : > { %s1691_s27 = sld [smem:[#allocation6_spill]]  ;;  %s1692_s25 = smov %s1299_s26 }
 0x649   : > { %s1694_s28 = smov %s1408_s14  ;;  %26 = sbr.rel (!%p24_p8) target bundleno = 10 (0xa), region = 118 }
 0x64d   : > { %s1693_s26 = smov %s1690_s20 }
 0x64e   :  { %1063 = vsyncpa [#allocation3], 1 }
 0x64f   :  { %1065 = vsyncpa [#allocation3 + $0x1], 1 }

// kernel: transformer_decoder_layer.3
= control target key start
LH: loop header
LB: loop body
LE: loop exit
PB: predicated region body
PF: predicated region fallthrough
CT: control target
= control target key end

     0   :  { %16 = vsyncpa [#allocation3], 0  ;;  %s1423_s0 = inlined_call_operand.vmem [shape: f32[2,8,32], index: 0, kind: input, shape index: {}]   ;;  %s1424_s1 = inlined_call_operand.vmem [shape: f32[1,32], index: 1, kind: input, shape index: {}]   ;;  %s1425_s2 = inlined_call_operand.vmem [shape: f32[1,32], index: 2, kind: input, shape index: {}]   ;;  %s1426_s3 = inlined_call_operand.vmem [shape: f32[32,32], index: 3, kind: input, shape index: {}]   ;;  %s1427_s4 = inlined_call_operand.vmem [shape: f32[1,32], index: 4, kind: input, shape index: {}]   ;;  %s1428_s5 = inlined_call_operand.hbm [shape: f32[32,32], index: 5, kind: input, shape index: {}]   ;;  %s1429_s6 = inlined_call_operand.vmem [shape: f32[1,32], index: 6, kind: input, shape index: {}]   ;;  %s1430_s7 = inlined_call_operand.hbm [shape: f32[32,32], index: 7, kind: input, shape index: {}]   ;;  %s1431_s8 = inlined_call_operand.vmem [shape: f32[1,32], index: 8, kind: input, shape index: {}]   ;;  %s1432_s9 = inlined_call_operand.hbm [shape: f32[32,32], index: 9, kind: input, shape index: {}]   ;;  %s1433_s10 = inlined_call_operand.vmem [shape: f32[1,32], index: 10, kind: input, shape index: {}]   ;;  %s1434_s11 = inlined_call_operand.vmem [shape: f32[2,8,32], index: 11, kind: output, shape index: {}]  }
   0x1   :  { %17 = vsyncpa [#allocation5], 0  ;;  %s1287_s17 = smov 0  }
   0x2 LB: > { %s1293_s18 = sadd.s32 4294967295, %s1216_s17   ;;  %p1009_p0 = scmp.ge.s32.totalorder %s1216_s17, 1  ;;  %s1216_s17 = sphi %s1287_s17, %s23_s17  }
   0x3   : > { %p290_p1 = scmp.lt.s32.totalorder %s1216_s17, 3  ;;  %p1063_p2 = scmp.eq.s32.totalorder %s1293_s18, 0 }
   0x4   : > { %s330_s21 = sshll.u32 %s1430_s7, 4  ;;  %s313_s25 = sshll.u32 %s1428_s5, 4  ;;  %s331_s21 = int_to_ptr.hbm [resolvable:$true] %s330_s21  ;;  %s314_s25 = int_to_ptr.hbm [resolvable:$true] %s313_s25 }
   0x5   : > { %p1301_p3 = pnand %p1009_p0, %p290_p1  ;;  %s1218_s26 = smov [#allocation4]  }
   0x6   : > { %s332_s27 = sshll.u32 %s1218_s26, 4  ;;  %s1219_s28 = smov [#allocation2]   ;;  %s333_s27 = int_to_ptr.vmem [resolvable:$true] %s332_s27 }
   0x7   : > { %p1053_p4 = pneg %p1301_p3  ;;  %s315_s29 = sshll.u32 %s1219_s28, 4  ;;  %s316_s29 = int_to_ptr.vmem [resolvable:$true] %s315_s29 }
   0x8   : > { %s347_s13 = sshll.u32 %s1432_s9, 4  ;;  %s1220_s14 = smov 128   ;;  %s348_s13 = int_to_ptr.hbm [resolvable:$true] %s347_s13 }
   0x9   : > { %p1054_p5 = pnand %p1063_p2, %p1053_p4  ;;  %s1221_s15 = smov 8  }
   0xa   : > { %s1222_s16 = smov [#allocation6]   ;;  %375 = sbr.rel (%p1301_p3) target bundleno = 1611 (0x64b), region = 64 }
   0xb   : > { %1059 = dma.hbm_to_vmem [thread:$0]  (!%p1054_p5), %s331_s21, 512, %s333_s27, [#allocation5], %s1220_s14, %s1220_s14, %s1221_s15  }
   0xc   : > { %1056 = dma.hbm_to_vmem [thread:$0]  (!%p1054_p5), %s314_s25, 512, %s316_s29, [#allocation3], %s1220_s14, %s1220_s14, %s1221_s15  }
   0xd   : > { %s349_s19 = sshll.u32 %s1222_s16, 4  ;;  %s350_s19 = int_to_ptr.vmem [resolvable:$true] %s349_s19 }
   0xe   : > { %1062 = dma.hbm_to_vmem [thread:$0]  (!%p1054_p5), %s348_s13, 512, %s350_s19, [#allocation5], %s1220_s14, %s1220_s14, %s1221_s15  }
   0xf   : > { %1207 = dma.done.wait (%p1063_p2), [#allocation3], 512  }
  0x10   : > { %1209 = vsyncadd (%p1063_p2), [#allocation3], 4294966784 }
  0x11   : > { %1211 = dma.done.wait (%p1063_p2), [#allocation5], 1024  }
  0x12   : > { %1213 = vsyncadd (%p1063_p2), [#allocation5], 4294966272  ;;  %p424_p6 = scmp.lt.s32.totalorder %s1293_s18, 1  ;;  %vm435_vm0 = vcmask 261120   ;;  %v1223_v2 = vmov 32.0   ;;  %v476_v14 = vld [vmem:[%s1426_s3 + $0x18] sm:$0xff] }
  0x13   : > { %1092 = vrcp.f32 %v1223_v2  ;;  %v508_v15 = vld [vmem:[#allocation2 + $0x18] sm:$0xff]  ;;  %496 = vmatpush.msra.mxu0 %v476_v14  ;;  %v475_v17 = vld [vmem:[%s1426_s3 + $0x10] sm:$0xff]  ;;  %v474_v20 = vld [vmem:[%s1426_s3 + $0x8] sm:$0xff]  ;;  %vm566_vm5 = vcmask 64512   ;;  %s1224_s24 = smov 112   ;;  %s1225_s25 = smov 120  }
  0x14   : > { %s1437_s18 = smov (!%p424_p6, %s1293_s18), 1  ;;  %v536_v16 = vld [vmem:[#allocation4 + $0x18] sm:$0xff]  ;;  %525 = vmatpush.msra.mxu1 %v508_v15  ;;  %v507_v18 = vld [vmem:[#allocation2 + $0x10] sm:$0xff]  ;;  %v506_v21 = vld [vmem:[#allocation2 + $0x8] sm:$0xff]  ;;  %s1226_s28 = smov 104  }
  0x15   : > { %s1018_s20 = sshll.u32 %s1437_s18, 3  ;;  %v535_v19 = vld [vmem:[#allocation4 + $0x10] sm:$0xff]  ;;  %553 = vmatpush.msra.mxu2 %v536_v16  ;;  %497 = vmatpush.msra.mxu0 %v475_v17  ;;  %v534_v22 = vld [vmem:[#allocation4 + $0x8] sm:$0xff]  ;;  %v473_v23 = vld [vmem:[%s1426_s3] sm:$0xff] }
  0x16   : > { %s427_s23 = scalar_lea.vmem %s1423_s0, %s1018_s20  ;;  %526 = vmatpush.msra.mxu1 %v507_v18  ;;  %v505_v24 = vld [vmem:[#allocation2] sm:$0xff]  ;;  %s431_s14 = scalar_lea.vmem %s1434_s11, %s1018_s20 }
  0x17   : > { %v1335_v0 = vld [vmem:[%s427_s23] sm:$0xff]  ;;  %554 = vmatpush.msra.mxu2 %v535_v19  ;;  %498 = vmatpush.msra.mxu0 %v474_v20 }
  0x18   : > { %v436_v1 = vsel %vm435_vm0, %v1335_v0, 0.0  ;;  %527 = vmatpush.msra.mxu1 %v506_v21  ;;  %v533_v25 = vld [vmem:[#allocation4] sm:$0xff] }
  0x19   : > { %437 = vadd.xlane.f32.xlu0 %v436_v1  ;;  %v1093_v3 = vpop.eup %1092  ;;  %555 = vmatpush.msra.mxu2 %v534_v22  ;;  %v1086_v35 = vld [vmem:[%s1424_s1] ss:$0 sm:$0xff] }
  0x1a   : > { %v440_v4 = vmul.f32 32.0, %v1093_v3  ;;  %vm444_vm1 = vweird.f32 %v1093_v3  ;;  %499 = vmatpush.msra.mxu0 %v473_v23  ;;  %528 = vmatpush.msra.mxu1 %v505_v24  ;;  %v1087_v38 = vld [vmem:[%s1425_s2] ss:$0 sm:$0xff] }
  0x1b   : > { %556 = vmatpush.msra.mxu2 %v533_v25  ;;  %v1088_v41 = vld [vmem:[%s1427_s4] ss:$0 sm:$0xff] }
  0x1c   : > { %v441_v5 = vsub.f32 1.0, %v440_v4  ;;  %v1089_v42 = vld [vmem:[%s1429_s6] ss:$0 sm:$0xff] }
  0x1d   : > { %v1090_v48 = vld [vmem:[%s1431_s8] ss:$0 sm:$0xff] }
  0x1e   : > { %v442_v6 = vmul.f32 %v1093_v3, %v441_v5 }
  0x20   : > { %v443_v7 = vadd.f32 %v1093_v3, %v442_v6 }
  0x22   : > { %v445_v8 = vsel %vm444_vm1, %v1093_v3, %v443_v7 }
  0x8c   : > { %v438_v9 = vpop.xlane.xlu0 %437 }
  0x8d   : > { %v446_v10 = vmul.f32 %v445_v8, %v438_v9 }
  0x8f   : > { %v447_v11 = vsub.f32 %v1335_v0, %v446_v10 }
  0x91   : > { %v448_v12 = vmul.f32 %v447_v11, %v447_v11 }
  0x93   : > { %v449_v13 = vsel %vm435_vm0, %v448_v12, 0.0 }
  0x94   : > { %450 = vadd.xlane.f32.xlu0 %v449_v13 }
 0x107   : > { %v451_v26 = vpop.xlane.xlu0 %450 }
 0x108   : > { %v452_v27 = vmul.f32 %v451_v26, %v445_v8 }
 0x10a   : > { %v453_v28 = vadd.f32 1e-05, %v452_v27 }
 0x10c   : > { %1094 = vrsqrt.f32 %v453_v28  ;;  %vm460_vm3 = vweird.f32 %v453_v28 }
 0x112   : > { %v1095_v29 = vpop.eup %1094 }
 0x113   : > { %v455_v30 = vmul.f32 %v1095_v29, %v453_v28  ;;  %vm461_vm2 = vweird.f32 %v1095_v29  ;;  %v562_v28 = vld [vmem:[#allocation6 + $0x8] sm:$0xff] }
 0x114   : > { %vm462_vm4 = vmor %vm460_vm3, %vm461_vm2  ;;  %711 = vmatpush.msrb.mxu2 %v562_v28 }
 0x115   : > { %v456_v31 = vmul.f32 %v1095_v29, %v455_v30 }
 0x117   : > { %v457_v32 = vmul.f32 0.5, %v456_v31 }
 0x119   : > { %v458_v33 = vsub.f32 1.5, %v457_v32 }
 0x11b   : > { %v459_v34 = vmul.f32 %v1095_v29, %v458_v33 }
 0x11d   : > { %v463_v36 = vsel %vm462_vm4, %v1095_v29, %v459_v34  ;;  %v563_v29 = vld [vmem:[#allocation6 + $0x10] sm:$0xff] }
 0x11e   : > { %v464_v37 = vmul.f32 %v463_v36, %v447_v11  ;;  %v561_v11 = vld [vmem:[#allocation6] sm:$0xff] }
 0x120   : > { %v468_v39 = vmul.f32 %v1086_v35, %v464_v37 }
 0x122   : > { %v472_v40 = vadd.f32 %v1087_v38, %v468_v39 }
 0x124   : > { %1020 = vmatmul.msk.f32.vlgmr.msra.gmra.mxu0 %vm435_vm0, %v472_v40  ;;  %1021 = vmatmul.msk.f32.vlgmr.msra.gmra.mxu1 %vm435_vm0, %v472_v40 }
 0x125   : > { %1022 = vmatmul.msk.f32.vlgmr.msra.gmra.mxu2 %vm435_vm0, %v472_v40 }
 0x126   : > { %822 = vmatpush.msra.mxu2 %v563_v29 }
 0x1a1   : > { %v501_v43 = vpop.f32.mrf.mxu0  ;;  %v530_v44 = vpop.f32.mrf.mxu1 }
 0x1a2   : > { %v502_v45 = vadd.f32 %v1088_v41, %v501_v43  ;;  %v531_v46 = vadd.f32 %v1089_v42, %v530_v44  ;;  %v564_v44 = vld [vmem:[#allocation6 + $0x18] sm:$0xff] }
 0x1a4   : > { %v504_v47 = vmul.f32 0.35355338, %v502_v45  ;;  %741 = vrot.lane.b32.xlu0 %v531_v46, %s1224_s24  ;;  %629 = vrot.lane.b32.xlu2 %v531_v46, %s1225_s25 }
 0x1a5   : > { %1023 = vmatpush.xpose.msk.msra.mxu3 %vm566_vm5, %v531_v46 }
 0x1a8   : > { %v558_v49 = vpop.f32.mrf.mxu2  ;;  %1024 = vmatmul.msk.f32.vlgmr.msra.gmra.mxu3 %vm566_vm5, %v504_v47 }
 0x1a9   : > { %v1375_v50 = vadd.f32 %v1090_v48, %v558_v49 }
 0x1ab   : > { %622 = vmatpush.msrb.mxu3 %v1375_v50 }
 0x1ac   : > { %627 = vrot.lane.b32.xlu2 %v504_v47, %s1225_s25 }
 0x1ad   : > { %734 = vmatpush.msra.mxu3 %v561_v11 }
 0x1b4   : > { %739 = vrot.lane.b32.xlu2 %v504_v47, %s1224_s24 }
 0x1bc   : > { %828 = vrot.lane.b32.xlu2 %v504_v47, %s1226_s28 }
 0x1fe   : > { %v630_v51 = vpop.permute.xlu2 %629 }
 0x1ff   : > { %1026 = vmatpush.xpose.msk.msrb.mxu0 %vm566_vm5, %v630_v51 }
 0x206   : > { %v628_v52 = vpop.permute.xlu2 %627 }
 0x207   : > { %1027 = vmatmul.msk.f32.vlgmr.msrb.gmra.mxu0 %vm566_vm5, %v628_v52 }
 0x20e   : > { %v740_v54 = vpop.permute.xlu2 %739 }
 0x216   : > { %v742_v53 = vpop.permute.xlu0 %741  ;;  %v829_v3 = vpop.permute.xlu2 %828 }
 0x217   : > { %1031 = vmatpush.xpose.msk.msra.mxu0 %vm566_vm5, %v742_v53 }
 0x21a   : > { %1032 = vmatmul.msk.f32.vlgmr.msra.gmra.mxu0 %vm566_vm5, %v740_v54 }
 0x22b   : > { %v590_v55 = vpop.f32.mrf.mxu3 }
 0x22c   : > { %v593_v56 = vsel %vm566_vm5, %v590_v55, -inf }
 0x22d   : > { %594 = vmax.xlane.f32.xlu1 %v593_v56 }
 0x284   : > { %v652_v57 = vpop.f32.mrf.mxu0 }
 0x285   : > { %v655_v58 = vsel %vm566_vm5, %v652_v57, -inf }
 0x286   : > { %656 = vmax.xlane.f32.xlu2 %v655_v58 }
 0x297   : > { %v764_v59 = vpop.f32.mrf.mxu0 }
 0x298   : > { %v767_v60 = vsel %vm566_vm5, %v764_v59, -inf }
 0x299   : > { %768 = vmax.xlane.f32.xlu0 %v767_v60 }
 0x2a0   : > { %v595_v61 = vpop.xlane.xlu1 %594 }
 0x2a1   : > { %v596_v62 = vsub.f32 %v590_v55, %v595_v61 }
 0x2a3   : > { %v597_v63 = vmul.f32 1.442695, %v596_v62 }
 0x2a5   : > { %1096 = vpow2.f32 %v597_v63 }
 0x2ab   : > { %v1097_v1 = vpop.eup %1096 }
 0x2ac   : > { %v599_v2 = vsel %vm566_vm5, %v1097_v1, 0.0 }
 0x2ad   : > { %600 = vadd.xlane.f32.xlu1 %v599_v2 }
 0x2c6   : > { %830 = vrot.lane.b32.xlu1 %v531_v46, %s1226_s28 }
 0x2f9   : > { %v657_v4 = vpop.xlane.xlu2 %656 }
 0x2fa   : > { %v658_v5 = vsub.f32 %v652_v57, %v657_v4 }
 0x2fc   : > { %v659_v6 = vmul.f32 1.442695, %v658_v5 }
 0x2fe   : > { %1098 = vpow2.f32 %v659_v6 }
 0x304   : > { %v1099_v7 = vpop.eup %1098 }
 0x305   : > { %v661_v8 = vsel %vm566_vm5, %v1099_v7, 0.0 }
 0x306   : > { %662 = vadd.xlane.f32.xlu2 %v661_v8 }
 0x30c   : > { %v769_v9 = vpop.xlane.xlu0 %768 }
 0x30d   : > { %v770_v10 = vsub.f32 %v764_v59, %v769_v9 }
 0x30f   : > { %v771_v12 = vmul.f32 1.442695, %v770_v10 }
 0x311   : > { %1100 = vpow2.f32 %v771_v12 }
 0x317   : > { %v1101_v13 = vpop.eup %1100 }
 0x318   : > { %v773_v14 = vsel %vm566_vm5, %v1101_v13, 0.0 }
 0x319   : > { %774 = vadd.xlane.f32.xlu0 %v773_v14 }
 0x31e   : > { %667 = vrot.lane.b32.xlu2 %v1375_v50, %s1225_s25 }
 0x320   : > { %v601_v15 = vpop.xlane.xlu1 %600 }
 0x321   : > { %1102 = vrcp.f32 %v601_v15 }
 0x327   : > { %v1103_v16 = vpop.eup %1102 }
 0x328   : > { %v603_v17 = vmul.f32 %v1103_v16, %v1097_v1 }
 0x32a   : > { %1025 = vmatmul.msk.f32.vlgmr.msrb.gmra.mxu3 %vm566_vm5, %v603_v17 }
 0x32d   : > { %778 = vrot.lane.b32.xlu0 %v1375_v50, %s1224_s24 }
 0x338   : > { %v831_v18 = vpop.permute.xlu1 %830 }
 0x339   : > { %1035 = vmatpush.xpose.msk.msrb.mxu3 %vm566_vm5, %v831_v18 }
 0x379   : > { %v663_v19 = vpop.xlane.xlu2 %662 }
 0x37a   : > { %1104 = vrcp.f32 %v663_v19 }
 0x380   : > { %v1105_v20 = vpop.eup %1104 }
 0x381   : > { %v668_v21 = vpop.permute.xlu2 %667  ;;  %v665_v22 = vmul.f32 %v1105_v20, %v1099_v7 }
 0x382   : > { %688 = vmatpush.msrb.mxu1 %v668_v21 }
 0x383   : > { %1028 = vmatmul.msk.f32.vlgmr.msrb.gmra.mxu1 %vm566_vm5, %v665_v22 }
 0x38c   : > { %v775_v23 = vpop.xlane.xlu0 %774 }
 0x38d   : > { %1106 = vrcp.f32 %v775_v23 }
 0x393   : > { %v1107_v24 = vpop.eup %1106 }
 0x394   : > { %v777_v25 = vmul.f32 %v1107_v24, %v1101_v13 }
 0x39f   : > { %v779_v26 = vpop.permute.xlu0 %778 }
 0x3a0   : > { %799 = vmatpush.msra.mxu1 %v779_v26 }
 0x3a1   : > { %1033 = vmatmul.msk.f32.vlgmr.msra.gmra.mxu1 %vm566_vm5, %v777_v25 }
 0x3a2   : > { %911 = vmatpush.msrb.mxu1 %v564_v44 }
 0x3ad   : > { %v624_v27 = vpop.f32.mrf.mxu3 }
 0x3ae   : > { %1030 = vmatmul.msk.f32.vlgmr.msra.gmra.mxu3 %vm566_vm5, %v624_v27 }
 0x3b6   : > { %1036 = vmatmul.msk.f32.vlgmr.msrb.gmra.mxu3 %vm566_vm5, %v829_v3 }
 0x400   : > { %v690_v30 = vpop.f32.mrf.mxu1 }
 0x401   : > { %1029 = vmatmul.msk.f32.vlgmr.msrb.gmra.mxu2 %vm566_vm5, %v690_v30 }
 0x41e   : > { %v801_v31 = vpop.f32.mrf.mxu1 }
 0x41f   : > { %1034 = vmatmul.msk.f32.vlgmr.msra.gmra.mxu2 %vm566_vm5, %v801_v31 }
 0x431   : > { %v736_v32 = vpop.f32.mrf.mxu3 }
 0x439   : > { %v853_v33 = vpop.f32.mrf.mxu3 }
 0x43a   : > { %v856_v34 = vsel %vm566_vm5, %v853_v33, -inf }
 0x43b   : > { %857 = vmax.xlane.f32.xlu1 %v856_v34 }
 0x484   : > { %v713_v46 = vpop.f32.mrf.mxu2 }
 0x485   : > { %v737_v48 = vadd.f32 %v736_v32, %v713_v46 }
 0x4a2   : > { %v824_v47 = vpop.f32.mrf.mxu2 }
 0x4a3   : > { %v827_v49 = vadd.f32 %v824_v47, %v737_v48 }
 0x4ae   : > { %v858_v35 = vpop.xlane.xlu1 %857 }
 0x4af   : > { %v859_v36 = vsub.f32 %v853_v33, %v858_v35 }
 0x4b1   : > { %v860_v37 = vmul.f32 1.442695, %v859_v36 }
 0x4b3   : > { %1108 = vpow2.f32 %v860_v37 }
 0x4b9   : > { %v1109_v38 = vpop.eup %1108 }
 0x4ba   : > { %v862_v39 = vsel %vm566_vm5, %v1109_v38, 0.0 }
 0x4bb   : > { %863 = vadd.xlane.f32.xlu1 %v862_v39 }
 0x4d4   : > { %867 = vrot.lane.b32.xlu1 %v1375_v50, %s1226_s28  ;;  %v1091_v50 = vld [vmem:[%s1433_s10] ss:$0 sm:$0xff] }
 0x52e   : > { %v864_v40 = vpop.xlane.xlu1 %863 }
 0x52f   : > { %1110 = vrcp.f32 %v864_v40 }
 0x535   : > { %v1111_v41 = vpop.eup %1110 }
 0x536   : > { %v866_v42 = vmul.f32 %v1111_v41, %v1109_v38 }
 0x546   : > { %v868_v43 = vpop.permute.xlu1 %867 }
 0x547   : > { %888 = vmatpush.msrb.mxu0 %v868_v43 }
 0x548   : > { %1037 = vmatmul.msk.f32.vlgmr.msrb.gmra.mxu0 %vm566_vm5, %v866_v42 }
 0x5c5   : > { %v890_v45 = vpop.f32.mrf.mxu0 }
 0x5c6   : > { %1038 = vmatmul.msk.f32.vlgmr.msrb.gmra.mxu1 %vm566_vm5, %v890_v45 }
 0x643   : > { %v913_v51 = vpop.f32.mrf.mxu1 }
 0x644   : > { %v916_v52 = vadd.f32 %v913_v51, %v827_v49 }
 0x646   : > { %v920_v53 = vadd.f32 %v1091_v50, %v916_v52 }
 0x648   : > { %v921_v54 = vadd.f32 %v920_v53, %v1335_v0 }
 0x64a   : > { %922 = vst.msk [vmem:[%s431_s14] sm:$0xff] %vm435_vm0, %v921_v54 }
 0x64b PF: > { %s23_s17 = sadd.s32 1, %s1216_s17  }
 0x64c   : > { %p20_p7 = scmp.ge.s32.totalorder %s23_s17, 4  }
 0x64e   :  { %22 = sbr.rel (!%p20_p7) target bundleno = 2 (0x2), region = 107 }
 0x653   :  { %942 = vsyncpa [#allocation3], 1 }
 0x654   :  { %944 = vsyncpa [#allocation3 + $0x1], 1 }
 0x655   :  { %945 = vsyncpa [#allocation5], 1 }

</bundles_post_ra>
